<compile_context>
chip_gen: v5e
topology: v5e:2x2
jax: 0.10.0
libtpu: 0.0.40
codegen_flags: <defaults>
</compile_context>

<pallas_src>
import jax
import jax.numpy as jnp
from jax.experimental import pallas as pl
from jax.experimental.pallas import tpu as pltpu

C1 = 0.01 ** 2
C2 = 0.03 ** 2


# ---------------------------------------------------------------------------
# In-kernel math helpers (values, not refs).
# ---------------------------------------------------------------------------

def _lane_shifts(a, lane0, laneN):
    """Reflected prev/next neighbors along the lane (last) axis via XLU rolls."""
    w = a.shape[-1]
    ar = pltpu.roll(a, 1, axis=a.ndim - 1)        # a[i-1] (circular)
    al = pltpu.roll(a, w - 1, axis=a.ndim - 1)    # a[i+1] (circular)
    prev = jnp.where(lane0, al, ar)               # reflect: prev[0]   = a[1]
    nxt = jnp.where(laneN, ar, al)                # reflect: next[W-1] = a[W-2]
    return prev, nxt


def _hpass(x, y):
    """Horizontal reflected 3-tap window sums of x, y, x^2, y^2, x*y.

    Shares the shifted x/y slabs across the five pooled quantities (4 rolls +
    4 selects total for this pass).
    """
    w = x.shape[-1]
    lane = jax.lax.broadcasted_iota(jnp.int32, (1, 1, w), 2)
    lane0 = lane == 0
    laneN = lane == w - 1

    xl, xr = _lane_shifts(x, lane0, laneN)
    yl, yr = _lane_shifts(y, lane0, laneN)

    hx = xl + x + xr
    hy = yl + y + yr
    hxx = xl * xl + x * x + xr * xr
    hyy = yl * yl + y * y + yr * yr
    hxy = xl * yl + x * y + xr * yr
    return hx, hy, hxx, hyy, hxy


def _vpass(q, q_top, q_bot, row0, rowN):
    """Vertical 3-tap window sum; boundary rows come from the (already
    horizontally pooled) halo rows q_top / q_bot."""
    sh = q.shape[1]
    qp = pltpu.roll(q, 1, axis=1)          # row above (circular)
    qn = pltpu.roll(q, sh - 1, axis=1)     # row below (circular)
    prev = jnp.where(row0, q_top, qp)
    nxt = jnp.where(rowN, q_bot, qn)
    return prev + q + nxt


def _ssim_tile(x, y, x_top, x_bot, y_top, y_bot):
    """SSIM loss map for one (Bc, Sh, W) strip given its raw halo rows."""
    sh = x.shape[1]
    row = jax.lax.broadcasted_iota(jnp.int32, (1, sh, 1), 1)
    row0 = row == 0
    rowN = row == sh - 1

    hx, hy, hxx, hyy, hxy = _hpass(x, y)
    tx, ty, txx, tyy, txy = _hpass(x_top, y_top)   # 1-row halos: negligible cost
    bx, by, bxx, byy, bxy = _hpass(x_bot, y_bot)

    sx = _vpass(hx, tx, bx, row0, rowN)
    sy = _vpass(hy, ty, by, row0, rowN)
    sxx = _vpass(hxx, txx, bxx, row0, rowN)
    syy = _vpass(hyy, tyy, byy, row0, rowN)
    sxy = _vpass(hxy, txy, bxy, row0, rowN)

    # Raw 3x3 window sums; the 1/9 (and 1/81) normalization factors cancel
    # between numerator and denominator when folded into the constants.
    c1 = 81.0 * C1
    c2 = 81.0 * C2
    t = 2.0 * (sx * sy)
    u = sx * sx + sy * sy
    num = (t + c1) * (18.0 * sxy - t + c2)
    den = (u + c1) * (9.0 * (sxx + syy) - u + c2)     # strictly positive

    r = pl.reciprocal(den, approx=True)               # EUP seed
    r = r * (2.0 - den * r)                           # one Newton step (~f32)
    return jnp.clip(0.5 - 0.5 * (num * r), 0.0, 1.0)


# ---------------------------------------------------------------------------
# Kernels.
# ---------------------------------------------------------------------------

def _ssim_full_kernel(x_ref, y_ref, o_ref):
    """Single-strip path: full-H channel blocks, reflection fully in-block."""
    x = x_ref[...].astype(jnp.float32)
    y = y_ref[...].astype(jnp.float32)
    h = x.shape[1]
    x_top, x_bot = x[:, 1:2, :], x[:, h - 2:h - 1, :]
    y_top, y_bot = y[:, 1:2, :], y[:, h - 2:h - 1, :]
    o_ref[...] = _ssim_tile(x, y, x_top, x_bot, y_top, y_bot).astype(o_ref.dtype)


def _ssim_strip_kernel(x_ref, y_ref, xt_ref, xb_ref, yt_ref, yb_ref, o_ref):
    """Row-strip path: (Bc, Sh, W) strips with 1-row halos streamed as extra
    8-row blocks of the same arrays. Global reflection at the frame top/bottom
    is handled by selecting in-strip rows for the first/last strip."""
    s = pl.program_id(1)
    first = s == 0
    last = s == pl.num_programs(1) - 1

    x = x_ref[...].astype(jnp.float32)
    y = y_ref[...].astype(jnp.float32)
    sh = x.shape[1]

    x_top = jnp.where(first, x[:, 1:2, :], xt_ref[:, 7:8, :].astype(jnp.float32))
    y_top = jnp.where(first, y[:, 1:2, :], yt_ref[:, 7:8, :].astype(jnp.float32))
    x_bot = jnp.where(last, x[:, sh - 2:sh - 1, :], xb_ref[:, 0:1, :].astype(jnp.float32))
    y_bot = jnp.where(last, y[:, sh - 2:sh - 1, :], yb_ref[:, 0:1, :].astype(jnp.float32))

    o_ref[...] = _ssim_tile(x, y, x_top, x_bot, y_top, y_bot).astype(o_ref.dtype)


# ---------------------------------------------------------------------------
# Wrapper: tiling choice + pallas_call.
# ---------------------------------------------------------------------------

def _divisors(n):
    return [d for d in range(1, n + 1) if n % d == 0]


def _vmem_limit_bytes():
    try:
        cap = int(pltpu.get_tpu_info().vmem_capacity_bytes)
    except Exception:
        cap = 64 << 20          # conservative fallback (v7x per-core VMEM)
    return (cap * 3) // 4


def _choose_tiling(nc, h, w, target_elems, strip_rows=None):
    """Pick (channel block Bc, strip rows Sh) for (nc, h, w) channel slabs."""
    if strip_rows is not None:
        assert h % strip_rows == 0, "strip_rows must divide H"
        if strip_rows < h:
            assert strip_rows % 8 == 0 and h % 8 == 0, (
                "strip tiling needs strip_rows and H to be multiples of 8")
        sh_cands = [strip_rows]
    elif h % 8 == 0:
        sh_cands = [d for d in _divisors(h) if d % 8 == 0]
    else:
        # TODO(synk): row-strip tiling for H not divisible by 8 (falls back to
        # full-H blocks; correct, but large frames with odd H stay VMEM-heavy).
        sh_cands = [h]

    best, best_key = None, None
    for bc in _divisors(nc):
        for sh in sh_cands:
            elems = bc * sh * w
            steps = (nc // bc) * (h // sh)
            key = (
                elems <= target_elems,                      # fits VMEM budget
                steps >= 4,                                 # pipelining + 2 cores
                elems if elems <= target_elems else -elems, # biggest fitting block
                sh,                                         # fewer strips -> less halo DMA
                steps % 2 == 0,                             # balance v7x cores
            )
            if best_key is None or key > best_key:
                best, best_key = (bc, sh), key
    return best


def ssim_pallas(x, y, kernel_size=3, padding=1, *,
                block_bytes_target=None, strip_rows=None):
    """SSIM loss map matching the PyTorch SSIM module (default config).

    x, y: (N, C, H, W) float arrays (f32 or bf16; compute is f32).
    Returns (N, C, H, W) in the input dtype.
    """
    assert kernel_size == 3 and padding == 1, (
        "ssim_pallas implements the module defaults (kernel_size=3, padding=1)")
    N, C, H, W = x.shape
    assert y.shape == x.shape
    assert H >= 2 and W >= 2, "reflection pad of 1 requires H, W >= 2"

    vmem_limit = _vmem_limit_bytes()
    if block_bytes_target is None:
        # ~16 live f32 temporaries + double-buffered I/O per input block.
        block_bytes_target = max(256 << 10, min(vmem_limit // 32, 2 << 20))
    target_elems = max(1, block_bytes_target // 4)

    NC = N * C
    xf = x.reshape(NC, H, W)
    yf = y.reshape(NC, H, W)

    Bc, Sh = _choose_tiling(NC, H, W, target_elems, strip_rows)
    n_cb, n_strips = NC // Bc, H // Sh

    out_shape = jax.ShapeDtypeStruct((NC, H, W), x.dtype)

    def _cp(sem):
        return pltpu.CompilerParams(dimension_semantics=sem,
                                    vmem_limit_bytes=int(vmem_limit))

    if n_strips == 1:
        out = pl.pallas_call(
            _ssim_full_kernel,
            out_shape=out_shape,
            grid_spec=pltpu.PrefetchScalarGridSpec(
                num_scalar_prefetch=0,
                grid=(n_cb,),
                in_specs=[pl.BlockSpec((Bc, H, W), lambda c: (c, 0, 0)),
                          pl.BlockSpec((Bc, H, W), lambda c: (c, 0, 0))],
                out_specs=pl.BlockSpec((Bc, H, W), lambda c: (c, 0, 0))),
            compiler_params=_cp(("parallel",)),
        )(xf, yf)
    else:
        sh8, h8 = Sh // 8, H // 8
        strip_spec = pl.BlockSpec((Bc, Sh, W), lambda c, s: (c, s, 0))
        # 8-row halo blocks (keeps the sublane-multiple-of-8 block constraint):
        # the row just above the strip is local row 7 of the "top" block, the
        # row just below is local row 0 of the "bot" block. Clamped indices on
        # the first/last strip are never read (in-strip reflection is used).
        top_spec = pl.BlockSpec(
            (Bc, 8, W), lambda c, s: (c, jnp.maximum(s * sh8 - 1, 0), 0))
        bot_spec = pl.BlockSpec(
            (Bc, 8, W), lambda c, s: (c, jnp.minimum((s + 1) * sh8, h8 - 1), 0))
        out = pl.pallas_call(
            _ssim_strip_kernel,
            out_shape=out_shape,
            grid_spec=pltpu.PrefetchScalarGridSpec(
                num_scalar_prefetch=0,
                grid=(n_cb, n_strips),
                in_specs=[strip_spec, strip_spec,
                          top_spec, bot_spec, top_spec, bot_spec],
                out_specs=strip_spec),
            compiler_params=_cp(("parallel", "parallel")),
        )(xf, yf, xf, xf, yf, yf)

    return out.reshape(N, C, H, W)


# ---------------------------------------------------------------------------
# Pure-JAX reference for verification.
# ---------------------------------------------------------------------------

def _ssim_reference(x, y, kernel_size=3, padding=1):
    pad_cfg = ((0, 0), (0, 0), (padding, padding), (padding, padding))
    xp = jnp.pad(x, pad_cfg, mode="reflect")
    yp = jnp.pad(y, pad_cfg, mode="reflect")

    def pool(a):
        return jax.lax.reduce_window(
            a, 0.0, jax.lax.add,
            window_dimensions=(1, 1, kernel_size, kernel_size),
            window_strides=(1, 1, 1, 1), padding="VALID",
        ) / float(kernel_size * kernel_size)

    mu_x, mu_y = pool(xp), pool(yp)
    sigma_x = pool(xp * xp) - mu_x ** 2
    sigma_y = pool(yp * yp) - mu_y ** 2
    sigma_xy = pool(xp * yp) - mu_x * mu_y
    n = (2 * mu_x * mu_y + C1) * (2 * sigma_xy + C2)
    d = (mu_x ** 2 + mu_y ** 2 + C1) * (sigma_x + sigma_y + C2)
    return jnp.clip((1 - n / d) / 2, 0.0, 1.0)


if __name__ == "__main__":
    key = jax.random.PRNGKey(0)
    kx, ky = jax.random.split(key)
    N, C, H, W = 2, 4, 16, 16
    x = jax.random.uniform(kx, (N, C, H, W), dtype=jnp.float32)
    y = jax.random.uniform(ky, (N, C, H, W), dtype=jnp.float32)

    ref = _ssim_reference(x, y)

    # Exercise: auto tiling, the halo row-strip path, and the full-H path.
    for kwargs in ({}, {"strip_rows": 8}, {"strip_rows": 16}):
        out = jax.block_until_ready(ssim_pallas(x, y, **kwargs))
        assert out.shape == (N, C, H, W), out.shape
        err = float(jnp.max(jnp.abs(out - ref)))
        assert err < 1e-4, (kwargs, err)

    # Odd channel count (N*C = 3) and non-multiple-of-128 width.
    x2 = jax.random.uniform(kx, (1, 3, 16, 24), dtype=jnp.float32)
    y2 = jax.random.uniform(ky, (1, 3, 16, 24), dtype=jnp.float32)
    out2 = jax.block_until_ready(ssim_pallas(x2, y2, strip_rows=8))
    err2 = float(jnp.max(jnp.abs(out2 - _ssim_reference(x2, y2))))
    assert err2 < 1e-4, err2

    print("KERNEL_OK")
</pallas_src>

<mosaic_0001>
module attributes {stable_mosaic.version = 11 : i64} {
  func.func @_ssim_full_kernel(%arg0: i32, %arg1: memref<2x16x16xf32, #tpu.memory_space<vmem>>, %arg2: memref<2x16x16xf32, #tpu.memory_space<vmem>>, %arg3: memref<2x16x16xf32, #tpu.memory_space<vmem>>) attributes {dimension_semantics = [#tpu.dimension_semantics<parallel>], iteration_bounds = array<i64: 4>, scalar_prefetch = 0 : i64, scratch_operands = 0 : i64, tpu.core_type = #tpu.core_type<tc>, window_params = [{transform_indices = @transform_0, window_bounds = array<i64: 2, 16, 16>}, {transform_indices = @transform_1, window_bounds = array<i64: 2, 16, 16>}, {transform_indices = @transform_2, window_bounds = array<i64: 2, 16, 16>}]} {
    %c0 = arith.constant 0 : index
    %c0_0 = arith.constant 0 : index
    %c0_1 = arith.constant 0 : index
    %0 = vector.load %arg1[%c0, %c0_0, %c0_1] : memref<2x16x16xf32, #tpu.memory_space<vmem>>, vector<2x16x16xf32>
    %c0_2 = arith.constant 0 : index
    %c0_3 = arith.constant 0 : index
    %c0_4 = arith.constant 0 : index
    %1 = vector.load %arg2[%c0_2, %c0_3, %c0_4] : memref<2x16x16xf32, #tpu.memory_space<vmem>>, vector<2x16x16xf32>
    %2 = vector.extract_strided_slice %0 {offsets = [0, 1, 0], sizes = [2, 1, 16], strides = [1, 1, 1]} : vector<2x16x16xf32> to vector<2x1x16xf32>
    %3 = vector.extract_strided_slice %0 {offsets = [0, 14, 0], sizes = [2, 1, 16], strides = [1, 1, 1]} : vector<2x16x16xf32> to vector<2x1x16xf32>
    %4 = vector.extract_strided_slice %1 {offsets = [0, 1, 0], sizes = [2, 1, 16], strides = [1, 1, 1]} : vector<2x16x16xf32> to vector<2x1x16xf32>
    %5 = vector.extract_strided_slice %1 {offsets = [0, 14, 0], sizes = [2, 1, 16], strides = [1, 1, 1]} : vector<2x16x16xf32> to vector<2x1x16xf32>
    %6 = tpu.iota {dimensions = array<i32: 1>} : vector<1x16x1xi32>
    %c0_i32 = arith.constant 0 : i32
    %7 = vector.broadcast %c0_i32 : i32 to vector<1x16x1xi32>
    %8 = arith.cmpi eq, %6, %7 : vector<1x16x1xi32>
    %c15_i32 = arith.constant 15 : i32
    %9 = vector.broadcast %c15_i32 : i32 to vector<1x16x1xi32>
    %10 = arith.cmpi eq, %6, %9 : vector<1x16x1xi32>
    %11 = tpu.iota {dimensions = array<i32: 2>} : vector<1x1x16xi32>
    %c0_i32_5 = arith.constant 0 : i32
    %12 = vector.broadcast %c0_i32_5 : i32 to vector<1x1x16xi32>
    %13 = arith.cmpi eq, %11, %12 : vector<1x1x16xi32>
    %c15_i32_6 = arith.constant 15 : i32
    %14 = vector.broadcast %c15_i32_6 : i32 to vector<1x1x16xi32>
    %15 = arith.cmpi eq, %11, %14 : vector<1x1x16xi32>
    %c1_i32 = arith.constant 1 : i32
    %16 = tpu.dynamic_rotate %0 by %c1_i32 dim 2 : vector<2x16x16xf32>, i32 -> vector<2x16x16xf32>
    %c15_i32_7 = arith.constant 15 : i32
    %17 = tpu.dynamic_rotate %0 by %c15_i32_7 dim 2 : vector<2x16x16xf32>, i32 -> vector<2x16x16xf32>
    %18 = vector.shape_cast %13 : vector<1x1x16xi1> to vector<1x1x16xi1>
    %19 = vector.broadcast %18 : vector<1x1x16xi1> to vector<2x16x16xi1>
    %20 = arith.select %19, %17, %16 : vector<2x16x16xi1>, vector<2x16x16xf32>
    %21 = vector.shape_cast %15 : vector<1x1x16xi1> to vector<1x1x16xi1>
    %22 = vector.broadcast %21 : vector<1x1x16xi1> to vector<2x16x16xi1>
    %23 = arith.select %22, %16, %17 : vector<2x16x16xi1>, vector<2x16x16xf32>
    %c1_i32_8 = arith.constant 1 : i32
    %24 = tpu.dynamic_rotate %1 by %c1_i32_8 dim 2 : vector<2x16x16xf32>, i32 -> vector<2x16x16xf32>
    %c15_i32_9 = arith.constant 15 : i32
    %25 = tpu.dynamic_rotate %1 by %c15_i32_9 dim 2 : vector<2x16x16xf32>, i32 -> vector<2x16x16xf32>
    %26 = vector.shape_cast %13 : vector<1x1x16xi1> to vector<1x1x16xi1>
    %27 = vector.broadcast %26 : vector<1x1x16xi1> to vector<2x16x16xi1>
    %28 = arith.select %27, %25, %24 : vector<2x16x16xi1>, vector<2x16x16xf32>
    %29 = vector.shape_cast %15 : vector<1x1x16xi1> to vector<1x1x16xi1>
    %30 = vector.broadcast %29 : vector<1x1x16xi1> to vector<2x16x16xi1>
    %31 = arith.select %30, %24, %25 : vector<2x16x16xi1>, vector<2x16x16xf32>
    %32 = arith.addf %20, %0 : vector<2x16x16xf32>
    %33 = arith.addf %32, %23 : vector<2x16x16xf32>
    %34 = arith.addf %28, %1 : vector<2x16x16xf32>
    %35 = arith.addf %34, %31 : vector<2x16x16xf32>
    %36 = arith.mulf %20, %20 : vector<2x16x16xf32>
    %37 = arith.mulf %0, %0 : vector<2x16x16xf32>
    %38 = arith.addf %36, %37 : vector<2x16x16xf32>
    %39 = arith.mulf %23, %23 : vector<2x16x16xf32>
    %40 = arith.addf %38, %39 : vector<2x16x16xf32>
    %41 = arith.mulf %28, %28 : vector<2x16x16xf32>
    %42 = arith.mulf %1, %1 : vector<2x16x16xf32>
    %43 = arith.addf %41, %42 : vector<2x16x16xf32>
    %44 = arith.mulf %31, %31 : vector<2x16x16xf32>
    %45 = arith.addf %43, %44 : vector<2x16x16xf32>
    %46 = arith.mulf %20, %28 : vector<2x16x16xf32>
    %47 = arith.mulf %0, %1 : vector<2x16x16xf32>
    %48 = arith.addf %46, %47 : vector<2x16x16xf32>
    %49 = arith.mulf %23, %31 : vector<2x16x16xf32>
    %50 = arith.addf %48, %49 : vector<2x16x16xf32>
    %51 = tpu.iota {dimensions = array<i32: 2>} : vector<1x1x16xi32>
    %c0_i32_10 = arith.constant 0 : i32
    %52 = vector.broadcast %c0_i32_10 : i32 to vector<1x1x16xi32>
    %53 = arith.cmpi eq, %51, %52 : vector<1x1x16xi32>
    %c15_i32_11 = arith.constant 15 : i32
    %54 = vector.broadcast %c15_i32_11 : i32 to vector<1x1x16xi32>
    %55 = arith.cmpi eq, %51, %54 : vector<1x1x16xi32>
    %c1_i32_12 = arith.constant 1 : i32
    %56 = tpu.dynamic_rotate %2 by %c1_i32_12 dim 2 : vector<2x1x16xf32>, i32 -> vector<2x1x16xf32>
    %c15_i32_13 = arith.constant 15 : i32
    %57 = tpu.dynamic_rotate %2 by %c15_i32_13 dim 2 : vector<2x1x16xf32>, i32 -> vector<2x1x16xf32>
    %58 = vector.shape_cast %53 : vector<1x1x16xi1> to vector<1x1x16xi1>
    %59 = vector.broadcast %58 : vector<1x1x16xi1> to vector<2x1x16xi1>
    %60 = arith.select %59, %57, %56 : vector<2x1x16xi1>, vector<2x1x16xf32>
    %61 = vector.shape_cast %55 : vector<1x1x16xi1> to vector<1x1x16xi1>
    %62 = vector.broadcast %61 : vector<1x1x16xi1> to vector<2x1x16xi1>
    %63 = arith.select %62, %56, %57 : vector<2x1x16xi1>, vector<2x1x16xf32>
    %c1_i32_14 = arith.constant 1 : i32
    %64 = tpu.dynamic_rotate %4 by %c1_i32_14 dim 2 : vector<2x1x16xf32>, i32 -> vector<2x1x16xf32>
    %c15_i32_15 = arith.constant 15 : i32
    %65 = tpu.dynamic_rotate %4 by %c15_i32_15 dim 2 : vector<2x1x16xf32>, i32 -> vector<2x1x16xf32>
    %66 = vector.shape_cast %53 : vector<1x1x16xi1> to vector<1x1x16xi1>
    %67 = vector.broadcast %66 : vector<1x1x16xi1> to vector<2x1x16xi1>
    %68 = arith.select %67, %65, %64 : vector<2x1x16xi1>, vector<2x1x16xf32>
    %69 = vector.shape_cast %55 : vector<1x1x16xi1> to vector<1x1x16xi1>
    %70 = vector.broadcast %69 : vector<1x1x16xi1> to vector<2x1x16xi1>
    %71 = arith.select %70, %64, %65 : vector<2x1x16xi1>, vector<2x1x16xf32>
    %72 = arith.addf %60, %2 : vector<2x1x16xf32>
    %73 = arith.addf %72, %63 : vector<2x1x16xf32>
    %74 = arith.addf %68, %4 : vector<2x1x16xf32>
    %75 = arith.addf %74, %71 : vector<2x1x16xf32>
    %76 = arith.mulf %60, %60 : vector<2x1x16xf32>
    %77 = arith.mulf %2, %2 : vector<2x1x16xf32>
    %78 = arith.addf %76, %77 : vector<2x1x16xf32>
    %79 = arith.mulf %63, %63 : vector<2x1x16xf32>
    %80 = arith.addf %78, %79 : vector<2x1x16xf32>
    %81 = arith.mulf %68, %68 : vector<2x1x16xf32>
    %82 = arith.mulf %4, %4 : vector<2x1x16xf32>
    %83 = arith.addf %81, %82 : vector<2x1x16xf32>
    %84 = arith.mulf %71, %71 : vector<2x1x16xf32>
    %85 = arith.addf %83, %84 : vector<2x1x16xf32>
    %86 = arith.mulf %60, %68 : vector<2x1x16xf32>
    %87 = arith.mulf %2, %4 : vector<2x1x16xf32>
    %88 = arith.addf %86, %87 : vector<2x1x16xf32>
    %89 = arith.mulf %63, %71 : vector<2x1x16xf32>
    %90 = arith.addf %88, %89 : vector<2x1x16xf32>
    %91 = tpu.iota {dimensions = array<i32: 2>} : vector<1x1x16xi32>
    %c0_i32_16 = arith.constant 0 : i32
    %92 = vector.broadcast %c0_i32_16 : i32 to vector<1x1x16xi32>
    %93 = arith.cmpi eq, %91, %92 : vector<1x1x16xi32>
    %c15_i32_17 = arith.constant 15 : i32
    %94 = vector.broadcast %c15_i32_17 : i32 to vector<1x1x16xi32>
    %95 = arith.cmpi eq, %91, %94 : vector<1x1x16xi32>
    %c1_i32_18 = arith.constant 1 : i32
    %96 = tpu.dynamic_rotate %3 by %c1_i32_18 dim 2 : vector<2x1x16xf32>, i32 -> vector<2x1x16xf32>
    %c15_i32_19 = arith.constant 15 : i32
    %97 = tpu.dynamic_rotate %3 by %c15_i32_19 dim 2 : vector<2x1x16xf32>, i32 -> vector<2x1x16xf32>
    %98 = vector.shape_cast %93 : vector<1x1x16xi1> to vector<1x1x16xi1>
    %99 = vector.broadcast %98 : vector<1x1x16xi1> to vector<2x1x16xi1>
    %100 = arith.select %99, %97, %96 : vector<2x1x16xi1>, vector<2x1x16xf32>
    %101 = vector.shape_cast %95 : vector<1x1x16xi1> to vector<1x1x16xi1>
    %102 = vector.broadcast %101 : vector<1x1x16xi1> to vector<2x1x16xi1>
    %103 = arith.select %102, %96, %97 : vector<2x1x16xi1>, vector<2x1x16xf32>
    %c1_i32_20 = arith.constant 1 : i32
    %104 = tpu.dynamic_rotate %5 by %c1_i32_20 dim 2 : vector<2x1x16xf32>, i32 -> vector<2x1x16xf32>
    %c15_i32_21 = arith.constant 15 : i32
    %105 = tpu.dynamic_rotate %5 by %c15_i32_21 dim 2 : vector<2x1x16xf32>, i32 -> vector<2x1x16xf32>
    %106 = vector.shape_cast %93 : vector<1x1x16xi1> to vector<1x1x16xi1>
    %107 = vector.broadcast %106 : vector<1x1x16xi1> to vector<2x1x16xi1>
    %108 = arith.select %107, %105, %104 : vector<2x1x16xi1>, vector<2x1x16xf32>
    %109 = vector.shape_cast %95 : vector<1x1x16xi1> to vector<1x1x16xi1>
    %110 = vector.broadcast %109 : vector<1x1x16xi1> to vector<2x1x16xi1>
    %111 = arith.select %110, %104, %105 : vector<2x1x16xi1>, vector<2x1x16xf32>
    %112 = arith.addf %100, %3 : vector<2x1x16xf32>
    %113 = arith.addf %112, %103 : vector<2x1x16xf32>
    %114 = arith.addf %108, %5 : vector<2x1x16xf32>
    %115 = arith.addf %114, %111 : vector<2x1x16xf32>
    %116 = arith.mulf %100, %100 : vector<2x1x16xf32>
    %117 = arith.mulf %3, %3 : vector<2x1x16xf32>
    %118 = arith.addf %116, %117 : vector<2x1x16xf32>
    %119 = arith.mulf %103, %103 : vector<2x1x16xf32>
    %120 = arith.addf %118, %119 : vector<2x1x16xf32>
    %121 = arith.mulf %108, %108 : vector<2x1x16xf32>
    %122 = arith.mulf %5, %5 : vector<2x1x16xf32>
    %123 = arith.addf %121, %122 : vector<2x1x16xf32>
    %124 = arith.mulf %111, %111 : vector<2x1x16xf32>
    %125 = arith.addf %123, %124 : vector<2x1x16xf32>
    %126 = arith.mulf %100, %108 : vector<2x1x16xf32>
    %127 = arith.mulf %3, %5 : vector<2x1x16xf32>
    %128 = arith.addf %126, %127 : vector<2x1x16xf32>
    %129 = arith.mulf %103, %111 : vector<2x1x16xf32>
    %130 = arith.addf %128, %129 : vector<2x1x16xf32>
    %c1_i32_22 = arith.constant 1 : i32
    %131 = tpu.dynamic_rotate %33 by %c1_i32_22 dim 1 : vector<2x16x16xf32>, i32 -> vector<2x16x16xf32>
    %c15_i32_23 = arith.constant 15 : i32
    %132 = tpu.dynamic_rotate %33 by %c15_i32_23 dim 1 : vector<2x16x16xf32>, i32 -> vector<2x16x16xf32>
    %133 = vector.shape_cast %8 : vector<1x16x1xi1> to vector<1x16x1xi1>
    %134 = vector.broadcast %133 : vector<1x16x1xi1> to vector<2x16x16xi1>
    %135 = vector.shape_cast %73 : vector<2x1x16xf32> to vector<2x1x16xf32>
    %136 = vector.broadcast %135 : vector<2x1x16xf32> to vector<2x16x16xf32>
    %137 = arith.select %134, %136, %131 : vector<2x16x16xi1>, vector<2x16x16xf32>
    %138 = vector.shape_cast %10 : vector<1x16x1xi1> to vector<1x16x1xi1>
    %139 = vector.broadcast %138 : vector<1x16x1xi1> to vector<2x16x16xi1>
    %140 = vector.shape_cast %113 : vector<2x1x16xf32> to vector<2x1x16xf32>
    %141 = vector.broadcast %140 : vector<2x1x16xf32> to vector<2x16x16xf32>
    %142 = arith.select %139, %141, %132 : vector<2x16x16xi1>, vector<2x16x16xf32>
    %143 = arith.addf %137, %33 : vector<2x16x16xf32>
    %144 = arith.addf %143, %142 : vector<2x16x16xf32>
    %c1_i32_24 = arith.constant 1 : i32
    %145 = tpu.dynamic_rotate %35 by %c1_i32_24 dim 1 : vector<2x16x16xf32>, i32 -> vector<2x16x16xf32>
    %c15_i32_25 = arith.constant 15 : i32
    %146 = tpu.dynamic_rotate %35 by %c15_i32_25 dim 1 : vector<2x16x16xf32>, i32 -> vector<2x16x16xf32>
    %147 = vector.shape_cast %8 : vector<1x16x1xi1> to vector<1x16x1xi1>
    %148 = vector.broadcast %147 : vector<1x16x1xi1> to vector<2x16x16xi1>
    %149 = vector.shape_cast %75 : vector<2x1x16xf32> to vector<2x1x16xf32>
    %150 = vector.broadcast %149 : vector<2x1x16xf32> to vector<2x16x16xf32>
    %151 = arith.select %148, %150, %145 : vector<2x16x16xi1>, vector<2x16x16xf32>
    %152 = vector.shape_cast %10 : vector<1x16x1xi1> to vector<1x16x1xi1>
    %153 = vector.broadcast %152 : vector<1x16x1xi1> to vector<2x16x16xi1>
    %154 = vector.shape_cast %115 : vector<2x1x16xf32> to vector<2x1x16xf32>
    %155 = vector.broadcast %154 : vector<2x1x16xf32> to vector<2x16x16xf32>
    %156 = arith.select %153, %155, %146 : vector<2x16x16xi1>, vector<2x16x16xf32>
    %157 = arith.addf %151, %35 : vector<2x16x16xf32>
    %158 = arith.addf %157, %156 : vector<2x16x16xf32>
    %c1_i32_26 = arith.constant 1 : i32
    %159 = tpu.dynamic_rotate %40 by %c1_i32_26 dim 1 : vector<2x16x16xf32>, i32 -> vector<2x16x16xf32>
    %c15_i32_27 = arith.constant 15 : i32
    %160 = tpu.dynamic_rotate %40 by %c15_i32_27 dim 1 : vector<2x16x16xf32>, i32 -> vector<2x16x16xf32>
    %161 = vector.shape_cast %8 : vector<1x16x1xi1> to vector<1x16x1xi1>
    %162 = vector.broadcast %161 : vector<1x16x1xi1> to vector<2x16x16xi1>
    %163 = vector.shape_cast %80 : vector<2x1x16xf32> to vector<2x1x16xf32>
    %164 = vector.broadcast %163 : vector<2x1x16xf32> to vector<2x16x16xf32>
    %165 = arith.select %162, %164, %159 : vector<2x16x16xi1>, vector<2x16x16xf32>
    %166 = vector.shape_cast %10 : vector<1x16x1xi1> to vector<1x16x1xi1>
    %167 = vector.broadcast %166 : vector<1x16x1xi1> to vector<2x16x16xi1>
    %168 = vector.shape_cast %120 : vector<2x1x16xf32> to vector<2x1x16xf32>
    %169 = vector.broadcast %168 : vector<2x1x16xf32> to vector<2x16x16xf32>
    %170 = arith.select %167, %169, %160 : vector<2x16x16xi1>, vector<2x16x16xf32>
    %171 = arith.addf %165, %40 : vector<2x16x16xf32>
    %172 = arith.addf %171, %170 : vector<2x16x16xf32>
    %c1_i32_28 = arith.constant 1 : i32
    %173 = tpu.dynamic_rotate %45 by %c1_i32_28 dim 1 : vector<2x16x16xf32>, i32 -> vector<2x16x16xf32>
    %c15_i32_29 = arith.constant 15 : i32
    %174 = tpu.dynamic_rotate %45 by %c15_i32_29 dim 1 : vector<2x16x16xf32>, i32 -> vector<2x16x16xf32>
    %175 = vector.shape_cast %8 : vector<1x16x1xi1> to vector<1x16x1xi1>
    %176 = vector.broadcast %175 : vector<1x16x1xi1> to vector<2x16x16xi1>
    %177 = vector.shape_cast %85 : vector<2x1x16xf32> to vector<2x1x16xf32>
    %178 = vector.broadcast %177 : vector<2x1x16xf32> to vector<2x16x16xf32>
    %179 = arith.select %176, %178, %173 : vector<2x16x16xi1>, vector<2x16x16xf32>
    %180 = vector.shape_cast %10 : vector<1x16x1xi1> to vector<1x16x1xi1>
    %181 = vector.broadcast %180 : vector<1x16x1xi1> to vector<2x16x16xi1>
    %182 = vector.shape_cast %125 : vector<2x1x16xf32> to vector<2x1x16xf32>
    %183 = vector.broadcast %182 : vector<2x1x16xf32> to vector<2x16x16xf32>
    %184 = arith.select %181, %183, %174 : vector<2x16x16xi1>, vector<2x16x16xf32>
    %185 = arith.addf %179, %45 : vector<2x16x16xf32>
    %186 = arith.addf %185, %184 : vector<2x16x16xf32>
    %c1_i32_30 = arith.constant 1 : i32
    %187 = tpu.dynamic_rotate %50 by %c1_i32_30 dim 1 : vector<2x16x16xf32>, i32 -> vector<2x16x16xf32>
    %c15_i32_31 = arith.constant 15 : i32
    %188 = tpu.dynamic_rotate %50 by %c15_i32_31 dim 1 : vector<2x16x16xf32>, i32 -> vector<2x16x16xf32>
    %189 = vector.shape_cast %8 : vector<1x16x1xi1> to vector<1x16x1xi1>
    %190 = vector.broadcast %189 : vector<1x16x1xi1> to vector<2x16x16xi1>
    %191 = vector.shape_cast %90 : vector<2x1x16xf32> to vector<2x1x16xf32>
    %192 = vector.broadcast %191 : vector<2x1x16xf32> to vector<2x16x16xf32>
    %193 = arith.select %190, %192, %187 : vector<2x16x16xi1>, vector<2x16x16xf32>
    %194 = vector.shape_cast %10 : vector<1x16x1xi1> to vector<1x16x1xi1>
    %195 = vector.broadcast %194 : vector<1x16x1xi1> to vector<2x16x16xi1>
    %196 = vector.shape_cast %130 : vector<2x1x16xf32> to vector<2x1x16xf32>
    %197 = vector.broadcast %196 : vector<2x1x16xf32> to vector<2x16x16xf32>
    %198 = arith.select %195, %197, %188 : vector<2x16x16xi1>, vector<2x16x16xf32>
    %199 = arith.addf %193, %50 : vector<2x16x16xf32>
    %200 = arith.addf %199, %198 : vector<2x16x16xf32>
    %201 = arith.mulf %144, %158 : vector<2x16x16xf32>
    %cst = arith.constant 2.000000e+00 : f32
    %202 = vector.broadcast %cst : f32 to vector<2x16x16xf32>
    %203 = arith.mulf %202, %201 : vector<2x16x16xf32>
    %204 = arith.mulf %144, %144 : vector<2x16x16xf32>
    %205 = arith.mulf %158, %158 : vector<2x16x16xf32>
    %206 = arith.addf %204, %205 : vector<2x16x16xf32>
    %cst_32 = arith.constant 8.100000e-03 : f32
    %207 = vector.broadcast %cst_32 : f32 to vector<2x16x16xf32>
    %208 = arith.addf %203, %207 : vector<2x16x16xf32>
    %cst_33 = arith.constant 1.800000e+01 : f32
    %209 = vector.broadcast %cst_33 : f32 to vector<2x16x16xf32>
    %210 = arith.mulf %209, %200 : vector<2x16x16xf32>
    %211 = arith.subf %210, %203 : vector<2x16x16xf32>
    %cst_34 = arith.constant 7.290000e-02 : f32
    %212 = vector.broadcast %cst_34 : f32 to vector<2x16x16xf32>
    %213 = arith.addf %211, %212 : vector<2x16x16xf32>
    %214 = arith.mulf %208, %213 : vector<2x16x16xf32>
    %cst_35 = arith.constant 8.100000e-03 : f32
    %215 = vector.broadcast %cst_35 : f32 to vector<2x16x16xf32>
    %216 = arith.addf %206, %215 : vector<2x16x16xf32>
    %217 = arith.addf %172, %186 : vector<2x16x16xf32>
    %cst_36 = arith.constant 9.000000e+00 : f32
    %218 = vector.broadcast %cst_36 : f32 to vector<2x16x16xf32>
    %219 = arith.mulf %218, %217 : vector<2x16x16xf32>
    %220 = arith.subf %219, %206 : vector<2x16x16xf32>
    %cst_37 = arith.constant 7.290000e-02 : f32
    %221 = vector.broadcast %cst_37 : f32 to vector<2x16x16xf32>
    %222 = arith.addf %220, %221 : vector<2x16x16xf32>
    %223 = arith.mulf %216, %222 : vector<2x16x16xf32>
    %224 = tpu.reciprocal %223 {approx = true} : vector<2x16x16xf32> -> vector<2x16x16xf32>
    %225 = arith.mulf %223, %224 : vector<2x16x16xf32>
    %cst_38 = arith.constant 2.000000e+00 : f32
    %226 = vector.broadcast %cst_38 : f32 to vector<2x16x16xf32>
    %227 = arith.subf %226, %225 : vector<2x16x16xf32>
    %228 = arith.mulf %224, %227 : vector<2x16x16xf32>
    %229 = arith.mulf %214, %228 : vector<2x16x16xf32>
    %cst_39 = arith.constant 5.000000e-01 : f32
    %230 = vector.broadcast %cst_39 : f32 to vector<2x16x16xf32>
    %231 = arith.mulf %230, %229 : vector<2x16x16xf32>
    %cst_40 = arith.constant 5.000000e-01 : f32
    %232 = vector.broadcast %cst_40 : f32 to vector<2x16x16xf32>
    %233 = arith.subf %232, %231 : vector<2x16x16xf32>
    %cst_41 = arith.constant 0.000000e+00 : f32
    %cst_42 = arith.constant 1.000000e+00 : f32
    %234 = vector.broadcast %cst_41 : f32 to vector<2x16x16xf32>
    %235 = arith.maximumf %234, %233 : vector<2x16x16xf32>
    %236 = vector.broadcast %cst_42 : f32 to vector<2x16x16xf32>
    %237 = arith.minimumf %236, %235 : vector<2x16x16xf32>
    %c0_43 = arith.constant 0 : index
    %c0_44 = arith.constant 0 : index
    %c0_45 = arith.constant 0 : index
    %238 = vector.load %arg3[%c0_43, %c0_44, %c0_45] : memref<2x16x16xf32, #tpu.memory_space<vmem>>, vector<2x16x16xf32>
    tpu.vector_store %arg3[%c0_43, %c0_44, %c0_45], %237 {strides = array<i32>} : memref<2x16x16xf32, #tpu.memory_space<vmem>>, vector<2x16x16xf32>,
    return
  }
  func.func @transform_0(%arg0: i32) -> (i32, i32, i32) {
    %c0_i32 = arith.constant 0 : i32
    %c0_i32_0 = arith.constant 0 : i32
    %c0_i32_1 = arith.constant 0 : i32
    return %arg0, %c0_i32, %c0_i32_0 : i32, i32, i32
  }
  func.func @transform_1(%arg0: i32) -> (i32, i32, i32) {
    %c0_i32 = arith.constant 0 : i32
    %c0_i32_0 = arith.constant 0 : i32
    %c0_i32_1 = arith.constant 0 : i32
    return %arg0, %c0_i32, %c0_i32_0 : i32, i32, i32
  }
  func.func @transform_2(%arg0: i32) -> (i32, i32, i32) {
    %c0_i32 = arith.constant 0 : i32
    %c0_i32_0 = arith.constant 0 : i32
    %c0_i32_1 = arith.constant 0 : i32
    return %arg0, %c0_i32, %c0_i32_0 : i32, i32, i32
  }
}

</mosaic_0001>

<bundles_post_ra>
// kernel: tpu_custom_call.1
= control target key start
LH: loop header
LB: loop body
LE: loop exit
PB: predicated region body
PF: predicated region fallthrough
CT: control target
= control target key end

     0   :  { %7 = vsyncpa [#allocation3], 0  ;;  %s2356_s0 = inlined_call_operand.hbm [shape: f32[8,16,16], index: 0, kind: input, shape index: {}]   ;;  %s2357_s1 = inlined_call_operand.hbm [shape: f32[8,16,16], index: 1, kind: input, shape index: {}]   ;;  %s2358_s2 = inlined_call_operand.hbm [shape: f32[8,16,16], index: 2, kind: output, shape index: {}]  }
   0x1   :  { %9 = vsyncpa [#allocation3 + $0x1], 0 }
   0x2   :  { %10 = vsyncpa [#allocation6], 0 }
   0x3   :  { %12 = vsyncpa [#allocation6 + $0x1], 0 }
   0x4   :  { %13 = vsyncpa [#allocation4], 0 }
   0x5   :  { %15 = vsyncpa [#allocation4 + $0x1], 0  ;;  %s1330_s9 = smov 0   ;;  %s1332_s10 = smov 0  }
   0x6   :  { %s1334_s11 = smov 0   ;;  %s1336_s12 = smov 0  }
   0x7 LB: > { %s1351_s13 = sadd.s32 4294967295, %s1306_s12   ;;  %s1083_s14 = sadd.s32 4294967294, %s1306_s12   ;;  %s1306_s12 = sphi %s1336_s12, %s2470_s12   ;;  %s1302_s11 = sphi %s1334_s11, %s2469_s11   ;;  %s1298_s10 = sphi %s1332_s10, %s2468_s10   ;;  %s1294_s9 = sphi %s1330_s9, %s2467_s9  }
   0x8   : > { %s1355_s15 = sadd.s32 1, %s1306_s12   ;;  %s28_s16 = sadd.s32 1, %s1302_s11 }
   0x9   : > { %s25_s17 = ssub.s32 %s1306_s12, %s1355_s15  ;;  %p35_p0 = scmp.ne.s32.totalorder %s1302_s11, %s1298_s10 }
   0xa   : > { %p26_p1 = scmp.eq.s32.totalorder %s25_s17, 0  ;;  %p36_p2 = scmp.eq.s32.totalorder %s1306_s12, 0 }
   0xb   : > { %p41_p3 = scmp.ne.s32.totalorder %s1298_s10, %s1294_s9  ;;  %p42_p4 = scmp.eq.s32.totalorder %s1351_s13, 0 }
   0xc   : > { %s1367_s18 = scalar_select %p26_p1, %s1302_s11, %s28_s16  }
   0xd   : > { %p1369_p5 = por %p36_p2, %p35_p0  ;;  %p1373_p6 = por %p42_p4, %p41_p3 }
   0xe   : > { %p91_p7 = scmp.eq.s32.totalorder %s1351_s13, 3  ;;  %p97_p8 = scmp.eq.s32.totalorder %s1083_s14, 3 }
   0xf   : > { %p1127_p9 = scmp.lt.s32.totalorder %s1306_s12, 4  ;;  %s1388_s23 = sand.u32 1, %s1302_s11  }
  0x10   : > { %p1379_p10 = por %p91_p7, %p35_p0  ;;  %p1383_p11 = por %p97_p8, %p41_p3 }
  0x11   : > { %s1105_s24 = sshll.u32 %s1306_s12, 5  ;;  %s1086_s25 = sshll.u32 %s1388_s23, 5 }
  0x12   : > { %s127_s28 = scalar_lea.hbm %s2356_s0, %s1105_s24  ;;  %s121_s30 = scalar_lea.vmem [#allocation2], %s1086_s25 }
  0x13   : > { %s128_s29 = sshll.u32 %s127_s28, 4  ;;  %s130_s3 = sshll.u32 %s121_s30, 4  ;;  %s129_s29 = int_to_ptr.hbm [resolvable:$true] %s128_s29  ;;  %s131_s3 = int_to_ptr.vmem [resolvable:$true] %s130_s3 }
  0x14   : > { %p1401_p12 = pnand %p1127_p9, %p1369_p5  ;;  %p1094_p13 = scmp.ge.s32.totalorder %s1306_s12, 1 }
  0x15   : > { %p161_p0 = scmp.lt.s32.totalorder %s1306_s12, 5  ;;  %s118_s5 = scalar_lea.sflag [#allocation3], %s1388_s23 }
  0x16   : > { %s1176_s6 = sshra.s32 %s129_s29, 4  ;;  %p1180_p2 = pneg %p1401_p12  ;;  %s1177_s6 = int_to_ptr.hbm [resolvable:$true] %s1176_s6 }
  0x17   : > { %s1178_s7 = scalar_lea.hbm %s1177_s6, 32  ;;  %s1183_s16 = scalar_lea.hbm %s2356_s0, 128 }
  0x18   : > { %p1179_p1 = scmp.ne.s32.totalorder %s1177_s6, %s1178_s7  ;;  %p1184_p5 = scmp.lt.s32.totalorder %s1177_s6, %s2356_s0 }
  0x19   : > { %p1185_p7 = scmp.lt.s32.totalorder %s1183_s16, %s1178_s7 }
  0x1a   : > { %p1181_p3 = pnand %p1180_p2, %p1179_p1 }
  0x1b   : > { %p1186_p8 = por %p1185_p7, %p1184_p5 }
  0x1c   : > { %p1182_p4 = pneg %p1181_p3 }
  0x1e   : > { %p1187_p9 = pnand %p1186_p8, %p1182_p4 }
  0x20   : > { %1190 = shalt.err (!%p1187_p9)
}
  0x21   : > { %s1308_s26 = smov 128   ;;  %s1309_s27 = smov 8  }
  0x22   : > { %1119 = dma.hbm_to_vmem [thread:$0]  (!%p1401_p12), %s129_s29, 512, %s131_s3, %s118_s5, %s1308_s26, %s1308_s26, %s1309_s27  }
  0x23   : > { %p1425_p1 = pnand %p1094_p13, %p161_p0  ;;  %s150_s7 = scalar_lea.hbm %s2357_s1, %s1105_s24 }
  0x24   : > { %s151_s8 = sshll.u32 %s150_s7, 4  ;;  %s144_s14 = scalar_lea.vmem [#allocation5], %s1086_s25  ;;  %s152_s8 = int_to_ptr.hbm [resolvable:$true] %s151_s8 }
  0x25   : > { %s153_s16 = sshll.u32 %s144_s14, 4  ;;  %s141_s17 = scalar_lea.sflag [#allocation6], %s1388_s23  ;;  %s154_s16 = int_to_ptr.vmem [resolvable:$true] %s153_s16 }
  0x26   : > { %s1206_s19 = sshra.s32 %s152_s8, 4  ;;  %s1213_s30 = scalar_lea.hbm %s2357_s1, 128  ;;  %s1207_s19 = int_to_ptr.hbm [resolvable:$true] %s1206_s19 }
  0x27   : > { %s1208_s29 = scalar_lea.hbm %s1207_s19, 32  ;;  %p1214_p4 = scmp.lt.s32.totalorder %s1207_s19, %s2357_s1 }
  0x28   : > { %p1209_p3 = scmp.ne.s32.totalorder %s1207_s19, %s1208_s29  ;;  %p1215_p5 = scmp.lt.s32.totalorder %s1213_s30, %s1208_s29 }
  0x2a   : > { %p1211_p13 = pnand %p1209_p3, %p1180_p2  ;;  %p1216_p7 = por %p1215_p5, %p1214_p4 }
  0x2c   : > { %p1212_p0 = pneg %p1211_p13 }
  0x2e   : > { %p1217_p8 = pnand %p1216_p7, %p1212_p0 }
  0x30   : > { %1220 = shalt.err (!%p1217_p8)
}
  0x31   : > { %1122 = dma.hbm_to_vmem [thread:$0]  (!%p1401_p12), %s152_s8, 512, %s154_s16, %s141_s17, %s1308_s26, %s1308_s26, %s1309_s27  }
  0x32   : > { %165 = sbr.rel (%p1425_p1) target bundleno = 563 (0x233), region = 28 }
  0x37   : > { %s1451_s23 = sand.u32 1, %s1298_s10  }
  0x38   : > { %s1454_s25 = sshll.u32 %s1451_s23, 5  ;;  %s168_s7 = scalar_lea.sflag [#allocation3], %s1451_s23 }
  0x39   : > { %s171_s14 = scalar_lea.vmem [#allocation2], %s1454_s25 }
  0x3a   : > { %1281 = dma.done.wait (%p1373_p6), %s168_s7, 512  }
  0x3b   : > { %1283 = vsyncadd (%p1373_p6), %s168_s7, 4294966784  ;;  %s178_s4 = scalar_lea.sflag [#allocation6], %s1451_s23  ;;  %s181_s26 = scalar_lea.vmem [#allocation5], %s1454_s25 }
  0x3c   : > { %1285 = dma.done.wait (%p1373_p6), %s178_s4, 512  }
  0x3d   : > { %1287 = vsyncadd (%p1373_p6), %s178_s4, 4294966784  ;;  %v1468_v0 = vld [vmem:[%s171_s14 + $0x10] sm:$0xff]  ;;  %v1470_v1 = vld [vmem:[%s171_s14] sm:$0xff]  ;;  %s1310_s27 = smov 16   ;;  %vm230_vm0 = vcmask 1047680   ;;  %s1311_s20 = smov 127  }
  0x3e   : > { %237 = vrot.lane.b32.xlu1 %v1468_v0, %s1310_s27  ;;  %231 = vrot.lane.b32.xlu0 %v1470_v1, %s1310_s27  ;;  %v1476_v2 = vld [vmem:[%s181_s26] sm:$0xff]  ;;  %v1480_v3 = vld [vmem:[%s171_s14 + $0x18] sm:$0xff]  ;;  %v1506_v9 = vrot.slane %v1468_v0, 1  ;;  %v1509_v10 = vrot.slane %v1470_v1, 1  ;;  %s1312_s28 = smov 113   ;;  %vm965_vm7 = vcmask 130048  }
  0x3f   : > { %295 = vrot.lane.b32.xlu2 %v1476_v2, %s1310_s27  ;;  %v1482_v4 = vld [vmem:[%s171_s14 + $0x8] sm:$0xff]  ;;  %v1484_v5 = vld [vmem:[%s181_s26 + $0x18] sm:$0xff]  ;;  %v1492_v6 = vld [vmem:[%s181_s26 + $0x10] sm:$0xff]  ;;  %v1497_v8 = vrot.slane %v1476_v2, 1  ;;  %v1512_v11 = vrot.slane %v1480_v3, 6  ;;  %s2304_s8 = scalar_lea.vmem [#allocation7], %s1454_s25 }
  0x40   : > { %v1494_v7 = vld [vmem:[%s181_s26 + $0x8] sm:$0xff]  ;;  %v1521_v12 = vrot.slane %v1482_v4, 6  ;;  %v1524_v13 = vrot.slane %v1492_v6, 1  ;;  %v1531_v14 = vrot.slane %v1484_v5, 6  ;;  %s1109_s16 = sshll.u32 %s1351_s13, 5  ;;  %s984_s3 = sshll.u32 %s2304_s8, 4  ;;  %s985_s3 = int_to_ptr.vmem [resolvable:$true] %s984_s3 }
  0x41   : > { %2376 = vst [vmem:[#allocation11_spill] sm:$0xff] %v1512_v11  ;;  %v1534_v15 = vrot.slane %v1494_v7, 6  ;;  %s983_s29 = scalar_lea.hbm %s2358_s2, %s1109_s16  ;;  %s971_s30 = scalar_lea.sflag [#allocation4], %s1451_s23 }
  0x42   : > { %2377 = vst [vmem:[#allocation12_spill] sm:$0xff] %v1521_v12  ;;  %s986_s5 = sshll.u32 %s983_s29, 4  ;;  %s1256_s7 = scalar_lea.hbm %s2358_s2, 128  ;;  %s987_s5 = int_to_ptr.hbm [resolvable:$true] %s986_s5 }
  0x43   : > { %2378 = vst [vmem:[#allocation13_spill] sm:$0xff] %v1531_v14  ;;  %s1250_s24 = sshra.s32 %s987_s5, 4  ;;  %s1251_s24 = int_to_ptr.hbm [resolvable:$true] %s1250_s24 }
  0x44   : > { %2379 = vst [vmem:[#allocation14_spill] sm:$0xff] %v1534_v15  ;;  %s1252_s13 = scalar_lea.hbm %s1251_s24, 32  ;;  %p1257_p9 = scmp.lt.s32.totalorder %s1251_s24, %s2358_s2 }
  0x45   : > { %p1253_p6 = scmp.ne.s32.totalorder %s1251_s24, %s1252_s13  ;;  %p1258_p1 = scmp.lt.s32.totalorder %s1256_s7, %s1252_s13 }
  0x46   : > { %240 = vrot.lane.b32.xlu1 %v1480_v3, %s1310_s27  ;;  %234 = vrot.lane.b32.xlu0 %v1482_v4, %s1310_s27 }
  0x47   : > { %304 = vrot.lane.b32.xlu2 %v1484_v5, %s1310_s27  ;;  %p1254_p12 = pnand %p1253_p6, %p1379_p10  ;;  %p1259_p3 = por %p1258_p1, %p1257_p9 }
  0x49   : > { %p1255_p2 = pneg %p1254_p12 }
  0x4b   : > { %p1260_p13 = pnand %p1259_p3, %p1255_p2 }
  0x4e   : > { %301 = vrot.lane.b32.xlu1 %v1492_v6, %s1310_s27  ;;  %298 = vrot.lane.b32.xlu0 %v1494_v7, %s1310_s27 }
  0x4f   : > { %473 = vrot.lane.b32.xlu2 %v1497_v8, %s1310_s27 }
  0x56   : > { %440 = vrot.lane.b32.xlu1 %v1506_v9, %s1310_s27  ;;  %437 = vrot.lane.b32.xlu0 %v1509_v10, %s1310_s27 }
  0x57   : > { %562 = vrot.lane.b32.xlu2 %v1512_v11, %s1310_s27 }
  0x5e   : > { %559 = vrot.lane.b32.xlu1 %v1521_v12, %s1310_s27  ;;  %476 = vrot.lane.b32.xlu0 %v1524_v13, %s1310_s27 }
  0x66   : > { %598 = vrot.lane.b32.xlu1 %v1531_v14, %s1310_s27  ;;  %595 = vrot.lane.b32.xlu0 %v1534_v15, %s1310_s27 }
  0x99   : > { %v296_v20 = vpop.permute.xlu2 %295 }
  0x9a   : > { %v297_v25 = vsel %vm230_vm0, %v296_v20, %v1476_v2 }
  0xa1   : > { %v305_v30 = vpop.permute.xlu2 %304 }
  0xa2   : > { %v306_v31 = vsel %vm230_vm0, %v305_v30, %v1484_v5 }
  0xa9   : > { %v474_v36 = vpop.permute.xlu2 %473 }
  0xaa   : > { %v475_v37 = vsel %vm230_vm0, %v474_v36, %v1497_v8 }
  0xb0   : > { %v238_v16 = vpop.permute.xlu1 %237  ;;  %v232_v17 = vpop.permute.xlu0 %231 }
  0xb1   : > { %v233_v18 = vsel %vm230_vm0, %v232_v17, %v1470_v1  ;;  %v239_v19 = vsel %vm230_vm0, %v238_v16, %v1468_v0  ;;  %v563_v42 = vpop.permute.xlu2 %562 }
  0xb2   : > { %243 = vrot.lane.b32.xlu2 %v233_v18, %s1310_s27  ;;  %247 = vrot.lane.b32.xlu0 %v239_v19, %s1310_s27  ;;  %v564_v43 = vsel %vm230_vm0, %v563_v42, %v1512_v11  ;;  %v1663_v42 = vmul.f32 %v1470_v1, %v1470_v1 }
  0xb8   : > { %v241_v21 = vpop.permute.xlu1 %240  ;;  %v235_v22 = vpop.permute.xlu0 %234 }
  0xb9   : > { %v242_v23 = vsel %vm230_vm0, %v241_v21, %v1480_v3  ;;  %v236_v24 = vsel %vm230_vm0, %v235_v22, %v1482_v4 }
  0xba   : > { %249 = vrot.lane.b32.xlu1 %v242_v23, %s1310_s27  ;;  %245 = vrot.lane.b32.xlu2 %v236_v24, %s1310_s27 }
  0xc0   : > { %v302_v26 = vpop.permute.xlu1 %301  ;;  %v299_v27 = vpop.permute.xlu0 %298 }
  0xc1   : > { %v303_v28 = vsel %vm230_vm0, %v302_v26, %v1492_v6  ;;  %v300_v29 = vsel %vm230_vm0, %v299_v27, %v1494_v7 }
  0xc2   : > { %307 = vrot.lane.b32.xlu1 %v297_v25, %s1310_s27  ;;  %311 = vrot.lane.b32.xlu0 %v303_v28, %s1310_s27 }
  0xc3   : > { %309 = vrot.lane.b32.xlu2 %v300_v29, %s1310_s27 }
  0xc8   : > { %v441_v32 = vpop.permute.xlu1 %440  ;;  %v438_v33 = vpop.permute.xlu0 %437 }
  0xc9   : > { %v442_v34 = vsel %vm230_vm0, %v441_v32, %v1506_v9  ;;  %v439_v35 = vsel %vm230_vm0, %v438_v33, %v1509_v10 }
  0xca   : > { %313 = vrot.lane.b32.xlu1 %v306_v31, %s1310_s27  ;;  %445 = vrot.lane.b32.xlu0 %v442_v34, %s1310_s27 }
  0xcb   : > { %443 = vrot.lane.b32.xlu2 %v439_v35, %s1310_s27  ;;  %v219_v35 = vlaneseq }
  0xcd   : > { %v1652_v36 = vand.u32 127, %v219_v35 }
  0xcf   : > { %vm228_vm1 = vcmp.eq.s32.totalorder %v1652_v36, 0  ;;  %vm229_vm2 = vcmp.eq.s32.totalorder %v1652_v36, 15 }
  0xd0   : > { %v560_v38 = vpop.permute.xlu1 %559  ;;  %v477_v39 = vpop.permute.xlu0 %476 }
  0xd1   : > { %v561_v40 = vsel %vm230_vm0, %v560_v38, %v1521_v12  ;;  %v478_v41 = vsel %vm230_vm0, %v477_v39, %v1524_v13 }
  0xd2   : > { %479 = vrot.lane.b32.xlu1 %v475_v37, %s1310_s27  ;;  %565 = vrot.lane.b32.xlu0 %v561_v40, %s1310_s27 }
  0xd3   : > { %481 = vrot.lane.b32.xlu2 %v478_v41, %s1310_s27 }
  0xd8   : > { %v599_v44 = vpop.permute.xlu1 %598  ;;  %v596_v45 = vpop.permute.xlu0 %595 }
  0xd9   : > { %v600_v46 = vsel %vm230_vm0, %v599_v44, %v1531_v14  ;;  %v597_v47 = vsel %vm230_vm0, %v596_v45, %v1534_v15  ;;  %v1669_v44 = vshrl.u32 %v219_v35, 7  ;;  %v1767_v35 = vmul.f32 %v1484_v5, %v1484_v5 }
  0xda   : > { %567 = vrot.lane.b32.xlu1 %v564_v43, %s1310_s27  ;;  %603 = vrot.lane.b32.xlu0 %v600_v46, %s1310_s27  ;;  %v1676_v46 = vmul.f32 %v1468_v0, %v1468_v0 }
  0xdb   : > { %601 = vrot.lane.b32.xlu2 %v597_v47, %s1310_s27  ;;  %vm679_vm3 = vcmp.lt.s32.totalorder %v1669_v44, 1  ;;  %2384 = vst [vmem:[#allocation19_spill] sm:$0xff] %v1767_v35  ;;  %vm688_vm4 = vcmp.lt.s32.totalorder %v1669_v44, 7  ;;  %vm222_vm5 = vcmp.eq.s32.totalorder %v1669_v44, 0 }
 0x10c   : > { %v244_v48 = vpop.permute.xlu2 %243 }
 0x10d   : > { %v251_v49 = vsel %vm230_vm0, %v244_v48, %v1470_v1  ;;  %v1682_v48 = vmul.f32 %v1482_v4, %v1482_v4 }
 0x10e   : > { %261 = vrot.lane.b32.xlu2 %v251_v49, %s1311_s20 }
 0x10f   : > { %2380 = vst [vmem:[#allocation15_spill] sm:$0xff] %v1682_v48 }
 0x114   : > { %v246_v50 = vpop.permute.xlu2 %245 }
 0x115   : > { %v252_v51 = vsel %vm230_vm0, %v246_v50, %v1482_v4 }
 0x116   : > { %263 = vrot.lane.b32.xlu0 %v252_v51, %s1311_s20 }
 0x11d   : > { %v310_v60 = vpop.permute.xlu2 %309 }
 0x11e   : > { %273 = vrot.lane.b32.xlu0 %v251_v49, %s1312_s28  ;;  %v316_v61 = vsel %vm230_vm0, %v310_v60, %v1494_v7 }
 0x124   : > { %v248_v52 = vpop.permute.xlu0 %247 }
 0x125   : > { %v253_v53 = vsel %vm230_vm0, %v248_v52, %v1468_v0  ;;  %v444_v16 = vpop.permute.xlu2 %443  ;;  %v1693_v52 = vmul.f32 %v1480_v3, %v1480_v3 }
 0x126   : > { %265 = vrot.lane.b32.xlu1 %v253_v53, %s1311_s20  ;;  %v447_v17 = vsel %vm230_vm0, %v444_v16, %v1509_v10 }
 0x12c   : > { %v250_v54 = vpop.permute.xlu1 %249 }
 0x12d   : > { %v254_v55 = vsel %vm230_vm0, %v250_v54, %v1480_v3  ;;  %v482_v22 = vpop.permute.xlu2 %481 }
 0x12e   : > { %279 = vrot.lane.b32.xlu0 %v254_v55, %s1312_s28  ;;  %267 = vrot.lane.b32.xlu2 %v254_v55, %s1311_s20  ;;  %v484_v24 = vsel %vm230_vm0, %v482_v22, %v1524_v13 }
 0x12f   : > { %275 = vrot.lane.b32.xlu1 %v252_v51, %s1312_s28 }
 0x134   : > { %v308_v56 = vpop.permute.xlu1 %307  ;;  %v312_v57 = vpop.permute.xlu0 %311 }
 0x135   : > { %v315_v58 = vsel %vm230_vm0, %v308_v56, %v1476_v2  ;;  %v317_v59 = vsel %vm230_vm0, %v312_v57, %v1492_v6  ;;  %v602_v27 = vpop.permute.xlu2 %601 }
 0x136   : > { %277 = vrot.lane.b32.xlu2 %v253_v53, %s1312_s28  ;;  %327 = vrot.lane.b32.xlu0 %v317_v59, %s1311_s20  ;;  %v605_v28 = vsel %vm230_vm0, %v602_v27, %v1534_v15 }
 0x137   : > { %323 = vrot.lane.b32.xlu1 %v315_v58, %s1311_s20 }
 0x13c   : > { %v314_v62 = vpop.permute.xlu1 %313  ;;  %v446_v18 = vpop.permute.xlu0 %445 }
 0x13d   : > { %v318_v63 = vsel %vm230_vm0, %v314_v62, %v1484_v5  ;;  %v448_v19 = vsel %vm230_vm0, %v446_v18, %v1506_v9 }
 0x13e   : > { %325 = vrot.lane.b32.xlu2 %v316_v61, %s1311_s20  ;;  %337 = vrot.lane.b32.xlu0 %v316_v61, %s1312_s28 }
 0x13f   : > { %329 = vrot.lane.b32.xlu1 %v318_v63, %s1311_s20 }
 0x144   : > { %v480_v20 = vpop.permute.xlu1 %479  ;;  %v566_v26 = vpop.permute.xlu0 %565 }
 0x145   : > { %v483_v21 = vsel %vm230_vm0, %v480_v20, %v1497_v8  ;;  %v569_v29 = vsel %vm230_vm0, %v566_v26, %v1521_v12 }
 0x146   : > { %335 = vrot.lane.b32.xlu2 %v315_v58, %s1312_s28  ;;  %451 = vrot.lane.b32.xlu0 %v447_v17, %s1311_s20 }
 0x147   : > { %339 = vrot.lane.b32.xlu1 %v317_v59, %s1312_s28 }
 0x14c   : > { %v568_v23 = vpop.permute.xlu1 %567  ;;  %v604_v30 = vpop.permute.xlu0 %603 }
 0x14d   : > { %v570_v25 = vsel %vm230_vm0, %v568_v23, %v1512_v11  ;;  %v606_v31 = vsel %vm230_vm0, %v604_v30, %v1531_v14  ;;  %v1755_v30 = vmul.f32 %v1476_v2, %v1476_v2 }
 0x14e   : > { %341 = vrot.lane.b32.xlu2 %v318_v63, %s1312_s28  ;;  %459 = vrot.lane.b32.xlu0 %v448_v19, %s1312_s28 }
 0x14f   : > { %453 = vrot.lane.b32.xlu1 %v448_v19, %s1311_s20 }
 0x156   : > { %457 = vrot.lane.b32.xlu2 %v447_v17, %s1312_s28  ;;  %493 = vrot.lane.b32.xlu0 %v483_v21, %s1312_s28 }
 0x157   : > { %487 = vrot.lane.b32.xlu1 %v483_v21, %s1311_s20 }
 0x15e   : > { %489 = vrot.lane.b32.xlu2 %v484_v24, %s1311_s20  ;;  %575 = vrot.lane.b32.xlu0 %v570_v25, %s1311_s20 }
 0x15f   : > { %495 = vrot.lane.b32.xlu1 %v484_v24, %s1312_s28 }
 0x166   : > { %609 = vrot.lane.b32.xlu0 %v605_v28, %s1311_s20  ;;  %573 = vrot.lane.b32.xlu2 %v569_v29, %s1311_s20 }
 0x167   : > { %579 = vrot.lane.b32.xlu1 %v569_v29, %s1312_s28 }
 0x168   : > { %v262_v32 = vpop.permute.xlu2 %261 }
 0x16e   : > { %581 = vrot.lane.b32.xlu2 %v570_v25, %s1312_s28  ;;  %617 = vrot.lane.b32.xlu0 %v606_v31, %s1312_s28 }
 0x16f   : > { %611 = vrot.lane.b32.xlu1 %v606_v31, %s1311_s20 }
 0x176   : > { %615 = vrot.lane.b32.xlu2 %v605_v28, %s1312_s28 }
 0x188   : > { %v268_v33 = vpop.permute.xlu2 %267  ;;  %v264_v34 = vpop.permute.xlu0 %263 }
 0x190   : > { %v278_v37 = vpop.permute.xlu2 %277  ;;  %v274_v38 = vpop.permute.xlu0 %273 }
 0x191   : > { %v1657_v40 = vsel %vm228_vm1, %v262_v32, %v274_v38  ;;  %v1686_v49 = vsel %vm229_vm2, %v274_v38, %v262_v32 }
 0x192   : > { %v371_v41 = vmul.f32 %v1657_v40, %v1657_v40  ;;  %v355_v50 = vadd.f32 %v1657_v40, %v1470_v1  ;;  %v383_v63 = vmul.f32 %v1686_v49, %v1686_v49 }
 0x194   : > { %v379_v51 = vadd.f32 %v1663_v42, %v371_v41  ;;  %v1730_v19 = vadd.f32 %v355_v50, %v1686_v49  ;;  %v1776_v41 = vmul.f32 %v1484_v5, %v1480_v3 }
 0x196   : > { %v1746_v27 = vadd.f32 %v383_v63, %v379_v51  ;;  %2385 = vst [vmem:[#allocation20_spill] sm:$0xff] %v1776_v41 }
 0x198   : > { %v266_v39 = vpop.permute.xlu1 %265  ;;  %v1672_v45 = vpop.permute.xlu2 %325 }
 0x199   : > { %v1667_v43 = vsel %vm228_vm1, %v266_v39, %v278_v37  ;;  %v1698_v54 = vsel %vm229_vm2, %v278_v37, %v266_v39 }
 0x19a   : > { %v373_v47 = vmul.f32 %v1667_v43, %v1667_v43  ;;  %v357_v55 = vadd.f32 %v1667_v43, %v1468_v0  ;;  %v385_v23 = vmul.f32 %v1698_v54, %v1698_v54 }
 0x19c   : > { %v381_v16 = vadd.f32 %v1676_v46, %v373_v47  ;;  %v1749_v28 = vadd.f32 %v357_v55, %v1698_v54  ;;  %v675_v47 = vrot.slane %v1730_v19, 7  ;;  %v1787_v55 = vmul.f32 %v1494_v7, %v1482_v4 }
 0x19e   : > { %v1757_v31 = vadd.f32 %v385_v23, %v381_v16  ;;  %v1808_v23 = vmul.f32 %v1492_v6, %v1468_v0 }
 0x1a0   : > { %v280_v53 = vpop.permute.xlu0 %279  ;;  %v336_v32 = vpop.permute.xlu2 %335 }
 0x1a1   : > { %v276_v56 = vpop.permute.xlu1 %275  ;;  %v1704_v57 = vsel %vm228_vm1, %v268_v33, %v280_v53  ;;  %v1708_v58 = vsel %vm229_vm2, %v280_v53, %v268_v33 }
 0x1a2   : > { %v1712_v59 = vsel %vm228_vm1, %v264_v34, %v276_v56  ;;  %v1716_v60 = vsel %vm229_vm2, %v276_v56, %v264_v34  ;;  %v358_v61 = vadd.f32 %v1704_v57, %v1480_v3  ;;  %v374_v62 = vmul.f32 %v1704_v57, %v1704_v57 }
 0x1a3   : > { %v356_v17 = vadd.f32 %v1712_v59, %v1482_v4  ;;  %v372_v18 = vmul.f32 %v1712_v59, %v1712_v59  ;;  %v386_v22 = vmul.f32 %v1708_v58, %v1708_v58  ;;  %v384_v26 = vmul.f32 %v1716_v60, %v1716_v60 }
 0x1a4   : > { %v1733_v20 = vadd.f32 %v358_v61, %v1708_v58  ;;  %v382_v21 = vadd.f32 %v1693_v52, %v374_v62  ;;  %v1763_v34 = vmul.f32 %v1476_v2, %v1470_v1  ;;  %v1780_v1 = vmul.f32 %v1494_v7, %v1494_v7 }
 0x1a5   : > { %v1741_v24 = vadd.f32 %v356_v17, %v1716_v60  ;;  %v380_v25 = vadd.f32 %v1682_v48, %v372_v18  ;;  %v757_v3 = vrot.slane %v1746_v27, 7  ;;  %v676_v61 = vrot.slane %v1749_v28, 7 }
 0x1a6   : > { %2381 = vst [vmem:[#allocation16_spill] sm:$0xff] %v1733_v20  ;;  %v1751_v29 = vadd.f32 %v386_v22, %v382_v21  ;;  %v678_v38 = vrot.slane %v1733_v20, 7  ;;  %v758_v17 = vrot.slane %v1757_v31, 7  ;;  %v1799_v18 = vmul.f32 %v1492_v6, %v1492_v6 }
 0x1a7   : > { %v1759_v33 = vadd.f32 %v384_v26, %v380_v25  ;;  %v677_v37 = vrot.slane %v1741_v24, 7 }
 0x1a8   : > { %2382 = vst [vmem:[#allocation17_spill] sm:$0xff] %v1751_v29  ;;  %v1772_v39 = vpop.permute.xlu0 %327  ;;  %v760_v51 = vrot.slane %v1751_v29, 7  ;;  %v681_v22 = vsel %vm679_vm3, %v676_v61, %v678_v38 }
 0x1a9   : > { %2383 = vst [vmem:[#allocation18_spill] sm:$0xff] %v1759_v33  ;;  %v759_v50 = vrot.slane %v1759_v33, 7  ;;  %v324_v53 = vpop.permute.xlu1 %323  ;;  %v680_v21 = vsel %vm679_vm3, %v675_v47, %v677_v37  ;;  %v1848_v0 = vsel %vm679_vm3, %v677_v37, %v675_v47 }
 0x1aa   : > { %v347_v62 = vsel %vm228_vm1, %v324_v53, %v336_v32  ;;  %v762_v26 = vsel %vm679_vm3, %v758_v17, %v760_v51  ;;  %v351_v56 = vsel %vm229_vm2, %v336_v32, %v324_v53  ;;  %v1831_v32 = vadd.f32 %v681_v22, %v1733_v20 }
 0x1ab   : > { %v761_v25 = vsel %vm679_vm3, %v757_v3, %v759_v50  ;;  %v363_v16 = vadd.f32 %v347_v62, %v1476_v2  ;;  %v391_v63 = vmul.f32 %v347_v62, %v347_v62  ;;  %v411_v14 = vmul.f32 %v347_v62, %v1657_v40  ;;  %v342_v62 = vpop.permute.xlu2 %341 }
 0x1ac   : > { %v1825_v2 = vadd.f32 %v680_v21, %v1741_v24  ;;  %v1828_v4 = vadd.f32 %v761_v25, %v1759_v33  ;;  %2388 = vst [vmem:[#allocation23_spill] sm:$0xff] %v1831_v32  ;;  %v1834_v40 = vadd.f32 %v762_v26, %v1751_v29  ;;  %v403_v12 = vmul.f32 %v351_v56, %v351_v56 }
 0x1ad   : > { %v1836_v15 = vadd.f32 %v363_v16, %v351_v56  ;;  %v399_v48 = vadd.f32 %v1755_v30, %v391_v63  ;;  %v419_v25 = vadd.f32 %v1763_v34, %v411_v14  ;;  %v423_v22 = vmul.f32 %v351_v56, %v1686_v49 }
 0x1ae   : > { %2386 = vst [vmem:[#allocation21_spill] sm:$0xff] %v1825_v2  ;;  %v2390_v63 = vrot.slane %v1741_v24, 1  ;;  %v1860_v14 = vsel %vm679_vm3, %v759_v50, %v757_v3  ;;  %v2392_v49 = vrot.slane %v1759_v33, 1  ;;  %v2393_v56 = vrot.slane %v1746_v27, 1 }
 0x1af   : > { %2387 = vst [vmem:[#allocation22_spill] sm:$0xff] %v1828_v4 }
 0x1b0   : > { %2389 = vst [vmem:[#allocation24_spill] sm:$0xff] %v1834_v40  ;;  %v338_v53 = vpop.permute.xlu0 %337  ;;  %v2391_v40 = vrot.slane %v1730_v19, 1  ;;  %v1868_v37 = vsel %vm688_vm4, %v2393_v56, %v2392_v49  ;;  %v1882_v49 = vadd.f32 %v423_v22, %v419_v25  ;;  %v2397_v25 = vrot.slane %v1757_v31, 1 }
 0x1b1   : > { %v330_v11 = vpop.permute.xlu1 %329  ;;  %v348_v21 = vsel %vm228_vm1, %v1672_v45, %v338_v53 }
 0x1b2   : > { %v350_v26 = vsel %vm228_vm1, %v330_v11, %v342_v62  ;;  %v1856_v32 = vsel %vm688_vm4, %v2391_v40, %v2390_v63  ;;  %v392_v2 = vmul.f32 %v348_v21, %v348_v21  ;;  %v1874_v40 = vsel %vm679_vm3, %v678_v38, %v676_v61 }
 0x1b3   : > { %v394_v16 = vmul.f32 %v350_v26, %v350_v26  ;;  %v366_v47 = vadd.f32 %v350_v26, %v1484_v5  ;;  %v414_v4 = vmul.f32 %v350_v26, %v1704_v57  ;;  %v1876_v63 = vadd.f32 %v403_v12, %v399_v48  ;;  %v458_v50 = vpop.permute.xlu2 %457 }
 0x1b4   : > { %v354_v3 = vsel %vm229_vm2, %v342_v62, %v330_v11  ;;  %v364_v33 = vadd.f32 %v348_v21, %v1494_v7  ;;  %v352_v38 = vsel %vm229_vm2, %v338_v53, %v1672_v45  ;;  %v400_v12 = vadd.f32 %v1780_v1, %v392_v2 }
 0x1b5   : > { %v402_v57 = vadd.f32 %v1767_v35, %v394_v16  ;;  %v2394_v48 = vrot.slane %v1733_v20, 1  ;;  %v2395_v61 = vrot.slane %v1749_v28, 1  ;;  %v1900_v7 = vsel %vm679_vm3, %v760_v51, %v758_v17 }
 0x1b6   : > { %v2396_v62 = vrot.slane %v1751_v29, 1  ;;  %v1910_v2 = vadd.f32 %v366_v47, %v354_v3  ;;  %v406_v53 = vmul.f32 %v354_v3, %v354_v3  ;;  %v422_v22 = vadd.f32 %v1776_v41, %v414_v4 }
 0x1b7   : > { %v1896_v11 = vsel %vm688_vm4, %v2395_v61, %v2394_v48  ;;  %v2366_v56 = vrot.slane %v1876_v63, 7  ;;  %v1915_v51 = vadd.f32 %v364_v33, %v352_v38  ;;  %v404_v17 = vmul.f32 %v352_v38, %v352_v38 }
 0x1b8   : > { %v1908_v45 = vsel %vm688_vm4, %v2397_v25, %v2396_v62  ;;  %v452_v26 = vpop.permute.xlu0 %451  ;;  %v412_v48 = vmul.f32 %v348_v21, %v1712_v59  ;;  %v1920_v47 = vadd.f32 %v406_v53, %v402_v57  ;;  %v426_v25 = vmul.f32 %v354_v3, %v1708_v58 }
 0x1b9   : > { %v340_v61 = vpop.permute.xlu1 %339  ;;  %v1924_v16 = vadd.f32 %v404_v17, %v400_v12  ;;  %v424_v33 = vmul.f32 %v352_v38, %v1716_v60  ;;  %v1935_v57 = vsel %vm228_vm1, %v452_v26, %v458_v50  ;;  %v723_v60 = vrot.slane %v1915_v51, 7 }
 0x1ba   : > { %v349_v59 = vsel %vm228_vm1, %v1772_v39, %v340_v61  ;;  %v1930_v21 = vadd.f32 %v426_v25, %v422_v22  ;;  %v420_v12 = vadd.f32 %v1787_v55, %v412_v48  ;;  %v1950_v48 = vsel %vm229_vm2, %v458_v50, %v452_v26 }
 0x1bb   : > { %v393_v38 = vmul.f32 %v349_v59, %v349_v59  ;;  %v413_v25 = vmul.f32 %v349_v59, %v1667_v43  ;;  %v795_v5 = vrot.slane %v1924_v16, 7  ;;  %v365_v4 = vadd.f32 %v349_v59, %v1492_v6 }
 0x1bc   : > { %v503_v3 = vadd.f32 %v1935_v57, %v1509_v10  ;;  %v353_v43 = vsel %vm229_vm2, %v340_v61, %v1772_v39  ;;  %v511_v58 = vmul.f32 %v1935_v57, %v1935_v57  ;;  %v1961_v6 = vadd.f32 %v424_v33, %v420_v12 }
 0x1bd   : > { %v2398_v50 = vrot.slane %v1836_v15, 7  ;;  %v401_v10 = vadd.f32 %v1799_v18, %v393_v38  ;;  %v421_v53 = vadd.f32 %v1808_v23, %v413_v25  ;;  %v2399_v39 = vrot.slane %v1663_v42, 1 }
 0x1be   : > { %v505_v59 = vadd.f32 %v503_v3, %v1950_v48  ;;  %v521_v17 = vmul.f32 %v1950_v48, %v1950_v48  ;;  %v797_v12 = vsel %vm679_vm3, %v2366_v56, %v795_v5  ;;  %v1982_v38 = vadd.f32 %v365_v4, %v353_v43 }
 0x1bf   : > { %v725_v26 = vsel %vm679_vm3, %v2398_v50, %v723_v60  ;;  %v519_v61 = vadd.f32 %v2399_v39, %v511_v58  ;;  %v405_v3 = vmul.f32 %v353_v43, %v353_v43  ;;  %v425_v25 = vmul.f32 %v353_v43, %v1698_v54 }
 0x1c0   : > { %v460_v62 = vpop.permute.xlu0 %459  ;;  %v1994_v41 = vadd.f32 %v725_v26, %v1915_v51  ;;  %v697_v35 = vperm.slane %v505_v59, 0 }
 0x1c1   : > { %v454_v22 = vpop.permute.xlu1 %453  ;;  %v523_v50 = vadd.f32 %v521_v17, %v519_v61  ;;  %v1997_v56 = vadd.f32 %v405_v3, %v401_v10  ;;  %v1999_v54 = vadd.f32 %v425_v25, %v421_v53  ;;  %v2402_v3 = vrot.slane %v1836_v15, 7  ;;  %v490_v61 = vpop.permute.xlu2 %489 }
 0x1c2   : > { %v1976_v33 = vsel %vm228_vm1, %v454_v22, %v460_v62  ;;  %v1987_v42 = vsel %vm229_vm2, %v460_v62, %v454_v22  ;;  %v2400_v22 = vrot.slane %v1676_v46, 1  ;;  %v2403_v25 = vrot.slane %v1915_v51, 1 }
 0x1c3   : > { %v504_v58 = vadd.f32 %v1976_v33, %v1506_v9  ;;  %v512_v39 = vmul.f32 %v1976_v33, %v1976_v33  ;;  %v773_v17 = vperm.slane %v523_v50, 0  ;;  %v2005_v9 = vadd.f32 %v797_v12, %v1924_v16 }
 0x1c4   : > { %v522_v10 = vmul.f32 %v1987_v42, %v1987_v42  ;;  %v727_v46 = vsel %vm679_vm3, %v723_v60, %v2402_v3  ;;  %v2404_v12 = vrot.slane %v1836_v15, 1 }
 0x1c5   : > { %v506_v62 = vadd.f32 %v504_v58, %v1987_v42  ;;  %v520_v43 = vadd.f32 %v2400_v22, %v512_v39  ;;  %2401 = vst [vmem:[#allocation25_spill] sm:$0xff] %v2005_v9  ;;  %v699_v22 = vsel %vm222_vm5, %v697_v35, %v1848_v0  ;;  %v775_v4 = vsel %vm222_vm5, %v773_v17, %v1860_v14 }
 0x1c6   : > { %v733_v50 = vsel %vm688_vm4, %v2404_v12, %v2403_v25  ;;  %v2405_v12 = vrot.slane %v1876_v63, 7  ;;  %v2406_v0 = vrot.slane %v1924_v16, 1  ;;  %v713_v17 = vadd.f32 %v699_v22, %v1730_v19 }
 0x1c7   : > { %v524_v53 = vadd.f32 %v522_v10, %v520_v43  ;;  %v698_v59 = vperm.slane %v506_v62, 0  ;;  %v2407_v62 = vrot.slane %v1876_v63, 1  ;;  %v2408_v39 = vrot.slane %v1882_v49, 7 }
 0x1c8   : > { %v494_v58 = vpop.permute.xlu0 %493  ;;  %v799_v35 = vsel %vm679_vm3, %v795_v5, %v2405_v12  ;;  %v2409_v5 = vrot.slane %v1961_v6, 7  ;;  %v785_v9 = vadd.f32 %v775_v4, %v1746_v27  ;;  %v2410_v22 = vrot.slane %v1755_v30, 1 }
 0x1c9   : > { %v488_v26 = vpop.permute.xlu1 %487  ;;  %v805_v43 = vsel %vm688_vm4, %v2407_v62, %v2406_v0  ;;  %v2413_v4 = vrot.slane %v1882_v49, 1  ;;  %v717_v30 = vadd.f32 %v713_v17, %v1856_v32 }
 0x1ca   : > { %v499_v25 = vsel %vm228_vm1, %v488_v26, %v494_v58  ;;  %v501_v10 = vsel %vm229_vm2, %v494_v58, %v488_v26  ;;  %v835_v12 = vsel %vm679_vm3, %v2409_v5, %v2408_v39  ;;  %v701_v26 = vsel %vm222_vm5, %v698_v59, %v1874_v40 }
 0x1cb   : > { %v507_v14 = vadd.f32 %v499_v25, %v1497_v8  ;;  %v525_v60 = vmul.f32 %v499_v25, %v499_v25  ;;  %v539_v3 = vmul.f32 %v499_v25, %v1935_v57  ;;  %v774_v58 = vperm.slane %v524_v53, 0 }
 0x1cc   : > { %v535_v62 = vmul.f32 %v501_v10, %v501_v10  ;;  %v2411_v57 = vrot.slane %v1763_v34, 1  ;;  %v549_v29 = vmul.f32 %v501_v10, %v1950_v48  ;;  %v2412_v39 = vrot.slane %v1961_v6, 1 }
 0x1cd   : > { %v509_v8 = vadd.f32 %v507_v14, %v501_v10  ;;  %v533_v0 = vadd.f32 %v2410_v22, %v525_v60  ;;  %v530_v40 = vrot.slane %v1799_v18, 1  ;;  %v544_v59 = vrot.slane %v1808_v23, 1 }
 0x1ce   : > { %v547_v25 = vadd.f32 %v2411_v57, %v539_v3  ;;  %v841_v5 = vsel %vm688_vm4, %v2413_v4, %v2412_v39  ;;  %v2414_v34 = vrot.slane %v1982_v38, 7  ;;  %v2415_v48 = vrot.slane %v1910_v2, 7 }
 0x1cf   : > { %v737_v20 = vperm.slane %v509_v8, 0  ;;  %v537_v53 = vadd.f32 %v535_v62, %v533_v0  ;;  %v789_v10 = vadd.f32 %v785_v9, %v1868_v37  ;;  %v715_v14 = vadd.f32 %v701_v26, %v1749_v28 }
 0x1d0   : > { %v551_v60 = vadd.f32 %v549_v29, %v547_v25  ;;  %v728_v3 = vsel %vm679_vm3, %v2415_v48, %v2414_v34  ;;  %v777_v18 = vsel %vm222_vm5, %v774_v58, %v1900_v7  ;;  %v2093_v7 = vpop.permute.xlu2 %573 }
 0x1d1   : > { %v739_v23 = vsel %vm222_vm5, %v737_v20, %v727_v46  ;;  %v496_v32 = vpop.permute.xlu1 %495  ;;  %v809_v17 = vperm.slane %v537_v53, 0 }
 0x1d2   : > { %v749_v29 = vadd.f32 %v739_v23, %v1836_v15  ;;  %v845_v8 = vperm.slane %v551_v60, 0  ;;  %v500_v22 = vsel %vm228_vm1, %v490_v61, %v496_v32  ;;  %v502_v37 = vsel %vm229_vm2, %v496_v32, %v490_v61 }
 0x1d3   : > { %v508_v9 = vadd.f32 %v500_v22, %v1524_v13  ;;  %v526_v26 = vmul.f32 %v500_v22, %v500_v22  ;;  %v540_v0 = vmul.f32 %v500_v22, %v1976_v33  ;;  %v811_v20 = vsel %vm222_vm5, %v809_v17, %v799_v35 }
 0x1d4   : > { %v753_v58 = vadd.f32 %v749_v29, %v733_v50  ;;  %v847_v46 = vsel %vm222_vm5, %v845_v8, %v835_v12  ;;  %v536_v62 = vmul.f32 %v502_v37, %v502_v37  ;;  %v821_v57 = vadd.f32 %v811_v20, %v1876_v63 }
 0x1d5   : > { %v857_v25 = vadd.f32 %v847_v46, %v1882_v49  ;;  %v510_v61 = vadd.f32 %v508_v9, %v502_v37  ;;  %v534_v39 = vadd.f32 %v530_v40, %v526_v26  ;;  %v548_v53 = vadd.f32 %v544_v59, %v540_v0 }
 0x1d6   : > { %v865_v13 = vmul.f32 %v753_v58, %v717_v30  ;;  %v877_v4 = vmul.f32 %v753_v58, %v753_v58  ;;  %v550_v33 = vmul.f32 %v502_v37, %v1987_v42  ;;  %v825_v60 = vadd.f32 %v821_v57, %v805_v43 }
 0x1d7   : > { %v861_v50 = vadd.f32 %v857_v25, %v841_v5  ;;  %v538_v34 = vadd.f32 %v536_v62, %v534_v39  ;;  %v738_v48 = vperm.slane %v510_v61, 0  ;;  %v873_v35 = vmul.f32 %v717_v30, %v717_v30  ;;  %v576_v25 = vpop.permute.xlu0 %575 }
 0x1d8   : > { %v552_v23 = vadd.f32 %v550_v33, %v548_v53  ;;  %v2416_v12 = vrot.slane %v1910_v2, 1  ;;  %v2417_v32 = vrot.slane %v1982_v38, 1  ;;  %v2418_v40 = vrot.slane %v1997_v56, 7 }
 0x1d9   : > { %v2419_v17 = vrot.slane %v1920_v47, 7  ;;  %v787_v43 = vadd.f32 %v777_v18, %v1757_v31  ;;  %v909_v5 = vadd.f32 %v825_v60, %v789_v10  ;;  %v741_v59 = vsel %vm222_vm5, %v738_v48, %v728_v3 }
 0x1da   : > { %v734_v29 = vsel %vm688_vm4, %v2417_v32, %v2416_v12  ;;  %v810_v30 = vperm.slane %v538_v34, 0  ;;  %v869_v8 = vmul.f32 2.0, %v865_v13  ;;  %v889_v22 = vmul.f32 18.0, %v861_v50  ;;  %v582_v50 = vpop.permute.xlu2 %581 }
 0x1db   : > { %v800_v42 = vsel %vm679_vm3, %v2419_v17, %v2418_v40  ;;  %v751_v37 = vadd.f32 %v741_v59, %v1982_v38  ;;  %v846_v9 = vperm.slane %v552_v23, 0  ;;  %v719_v26 = vadd.f32 %v715_v14, %v1896_v11 }
 0x1dc   : > { %v881_v0 = vadd.f32 %v877_v4, %v873_v35  ;;  %v913_v58 = vmul.f32 9.0, %v909_v5  ;;  %v813_v20 = vsel %vm222_vm5, %v810_v30, %v800_v42  ;;  %v838_v46 = vrot.slane %v1999_v54, 1 }
 0x1dd   : > { %v755_v18 = vadd.f32 %v751_v37, %v734_v29  ;;  %v823_v10 = vadd.f32 %v813_v20, %v1997_v56  ;;  %v2420_v3 = vrot.slane %v1999_v54, 7  ;;  %v2421_v62 = vrot.slane %v1930_v21, 7 }
 0x1de   : > { %v2422_v11 = vrot.slane %v1961_v6, 7  ;;  %v2423_v14 = vrot.slane %v1882_v49, 7  ;;  %v917_v39 = vsub.f32 %v913_v58, %v881_v0  ;;  %v2424_v13 = vrot.slane %v1920_v47, 1 }
 0x1df   : > { %v836_v57 = vsel %vm679_vm3, %v2421_v62, %v2420_v3  ;;  %v2425_v4 = vrot.slane %v1997_v56, 1  ;;  %v791_v60 = vadd.f32 %v787_v43, %v1908_v45  ;;  %v893_v34 = vsub.f32 %v889_v22, %v869_v8  ;;  %v580_v22 = vpop.permute.xlu1 %579  ;;  %v2429_v3 = vld [vmem:[#allocation11_spill] sm:$0xff] }
 0x1e0   : > { %v2135_v61 = vsel %vm679_vm3, %v2423_v14, %v2422_v11  ;;  %v849_v33 = vsel %vm222_vm5, %v846_v9, %v836_v57  ;;  %v879_v35 = vmul.f32 %v755_v18, %v755_v18  ;;  %v875_v23 = vmul.f32 %v719_v26, %v719_v26 }
 0x1e1   : > { %v806_v53 = vsel %vm688_vm4, %v2425_v4, %v2424_v13  ;;  %v905_v12 = vadd.f32 0.0081, %v881_v0  ;;  %v921_v32 = vadd.f32 0.0729, %v917_v39  ;;  %v2148_v29 = vsel %vm228_vm1, %v576_v25, %v582_v50 }
 0x1e2   : > { %v827_v48 = vadd.f32 %v823_v10, %v806_v53  ;;  %v2426_v40 = vrot.slane %v1930_v21, 1  ;;  %v859_v45 = vadd.f32 %v849_v33, %v1999_v54  ;;  %v2158_v43 = vadd.s32 8, %v1669_v44 }
 0x1e3   : > { %v885_v5 = vadd.f32 0.0081, %v869_v8  ;;  %v925_v59 = vmul.f32 %v921_v32, %v905_v12  ;;  %v638_v30 = vrot.slane %v1693_v52, 6  ;;  %v2427_v37 = vrot.slane %v1730_v19, 1  ;;  %v2430_v52 = vld [vmem:[#allocation15_spill] sm:$0xff] }
 0x1e4   : > { %v842_v17 = vsel %vm688_vm4, %v838_v46, %v2426_v40  ;;  %v911_v42 = vadd.f32 %v827_v48, %v791_v60  ;;  %v2428_v9 = vrot.slane %v1741_v24, 1  ;;  %v897_v58 = vadd.f32 0.0729, %v893_v34 }
 0x1e5   : > { %v883_v20 = vadd.f32 %v879_v35, %v875_v23  ;;  %v626_v62 = vadd.f32 %v2148_v29, %v2429_v3  ;;  %1168 = vrcp.f32 %v925_v59  ;;  %v867_v57 = vmul.f32 %v755_v18, %v719_v26  ;;  %v2431_v18 = vld [vmem:[#allocation12_spill] sm:$0xff]  ;;  %v2432_v3 = vld [vmem:[#allocation14_spill] sm:$0xff] }
 0x1e6   : > { %v691_v0 = vsel %vm688_vm4, %v2428_v9, %v2427_v37  ;;  %v915_v10 = vmul.f32 9.0, %v911_v42  ;;  %v634_v8 = vmul.f32 %v2148_v29, %v2148_v29  ;;  %v637_v11 = vrot.slane %v2430_v52, 6 }
 0x1e7   : > { %v863_v14 = vadd.f32 %v859_v45, %v842_v17  ;;  %v585_v24 = vsel %vm228_vm1, %v2093_v7, %v580_v22  ;;  %v587_v39 = vsel %vm229_vm2, %v580_v22, %v2093_v7  ;;  %vm225_vm6 = vcmp.eq.s32.totalorder %v2158_v43, 15  ;;  %v610_v7 = vpop.permute.xlu0 %609  ;;  %v616_v45 = vpop.permute.xlu2 %615 }
 0x1e8   : > { %v919_v19 = vsub.f32 %v915_v10, %v883_v20  ;;  %v2181_v26 = vsel %vm229_vm2, %v582_v50, %v576_v25  ;;  %v625_v13 = vadd.f32 %v585_v24, %v2431_v18  ;;  %v633_v4 = vmul.f32 %v585_v24, %v585_v24 }
 0x1e9   : > { %v901_v53 = vmul.f32 %v897_v58, %v885_v5  ;;  %v907_v33 = vadd.f32 0.0081, %v883_v20  ;;  %v2185_v34 = vadd.f32 %v626_v62, %v2181_v26  ;;  %v871_v48 = vmul.f32 2.0, %v867_v57 }
 0x1ea   : > { %v923_v60 = vadd.f32 0.0729, %v919_v19  ;;  %v627_v35 = vadd.f32 %v625_v13, %v587_v39  ;;  %v641_v23 = vadd.f32 %v637_v11, %v633_v4  ;;  %v643_v12 = vmul.f32 %v587_v39, %v587_v39  ;;  %v2434_v4 = vld [vmem:[#allocation18_spill] sm:$0xff] }
 0x1eb   : > { %v891_v32 = vmul.f32 18.0, %v863_v14  ;;  %v642_v17 = vadd.f32 %v638_v30, %v634_v8  ;;  %v644_v25 = vmul.f32 %v2181_v26, %v2181_v26  ;;  %v1169_v50 = vpop.eup %1168  ;;  %v651_v22 = vrot.slane %v1780_v1, 6 }
 0x1ec   : > { %v927_v40 = vmul.f32 %v923_v60, %v907_v33  ;;  %v645_v42 = vadd.f32 %v643_v12, %v641_v23  ;;  %v707_v5 = vperm.slane %v627_v35, 0  ;;  %v665_v37 = vrot.slane %v1787_v55, 6  ;;  %v2436_v23 = vld [vmem:[#allocation21_spill] sm:$0xff] }
 0x1ed   : > { %v933_v9 = vmul.f32 %v1169_v50, %v925_v59  ;;  %v621_v58 = vsel %vm228_vm1, %v610_v7, %v616_v45  ;;  %v623_v20 = vsel %vm229_vm2, %v616_v45, %v610_v7  ;;  %v708_v30 = vperm.slane %v2185_v34, 0 }
 0x1ee   : > { %1170 = vrcp.f32 %v927_v40  ;;  %v779_v10 = vperm.slane %v645_v42, 0  ;;  %v629_v62 = vadd.f32 %v621_v58, %v2432_v3  ;;  %v647_v57 = vmul.f32 %v621_v58, %v621_v58 }
 0x1ef   : > { %v937_v8 = vsub.f32 2.0, %v933_v9  ;;  %v887_v52 = vadd.f32 0.0081, %v871_v48  ;;  %v710_v1 = vsel %vm225_vm6, %v707_v5, %v691_v0  ;;  %v661_v55 = vmul.f32 %v621_v58, %v585_v24  ;;  %v2439_v58 = vld [vmem:[#allocation22_spill] sm:$0xff] }
 0x1f0   : > { %v895_v59 = vsub.f32 %v891_v32, %v871_v48  ;;  %v631_v11 = vadd.f32 %v629_v62, %v623_v20  ;;  %v655_v14 = vadd.f32 %v651_v22, %v647_v57  ;;  %v657_v19 = vmul.f32 %v623_v20, %v623_v20 }
 0x1f1   : > { %v941_v18 = vmul.f32 %v1169_v50, %v937_v8  ;;  %v2433_v13 = vrot.slane %v1746_v27, 1  ;;  %v2435_v33 = vrot.slane %v2434_v4, 1  ;;  %v669_v34 = vadd.f32 %v665_v37, %v661_v55 }
 0x1f2   : > { %v671_v35 = vmul.f32 %v623_v20, %v587_v39  ;;  %v718_v12 = vadd.f32 %v2436_v23, %v710_v1  ;;  %v659_v24 = vadd.f32 %v657_v19, %v655_v14  ;;  %v743_v48 = vperm.slane %v631_v11, 0  ;;  %v2448_v14 = vld [vmem:[#allocation25_spill] sm:$0xff]  ;;  %v612_v23 = vpop.permute.xlu1 %611 }
 0x1f3   : > { %v771_v60 = vsel %vm688_vm4, %v2435_v33, %v2433_v13  ;;  %v945_v32 = vmul.f32 %v941_v18, %v901_v53  ;;  %v2208_v45 = vadd.f32 %v644_v25, %v642_v17  ;;  %v2437_v27 = vrot.slane %v1836_v15, 1 }
 0x1f4   : > { %v782_v0 = vsel %vm225_vm6, %v779_v10, %v771_v60  ;;  %v1171_v7 = vpop.eup %1170  ;;  %v2438_v50 = vrot.slane %v1915_v51, 1  ;;  %v673_v5 = vadd.f32 %v671_v35, %v669_v34  ;;  %v899_v39 = vadd.f32 0.0729, %v895_v59 }
 0x1f5   : > { %v935_v22 = vmul.f32 %v1171_v7, %v927_v40  ;;  %v815_v9 = vperm.slane %v659_v24, 0  ;;  %v790_v20 = vadd.f32 %v2439_v58, %v782_v0  ;;  %v2440_v53 = vrot.slane %v1876_v63, 1  ;;  %v2443_v63 = vld [vmem:[#allocation16_spill] sm:$0xff] }
 0x1f6   : > { %v735_v42 = vsel %vm688_vm4, %v2438_v50, %v2437_v27  ;;  %v2441_v17 = vrot.slane %v1924_v16, 1  ;;  %v851_v25 = vperm.slane %v673_v5, 0  ;;  %v949_v10 = vmul.f32 0.5, %v945_v32  ;;  %v2453_v27 = vld [vmem:[#allocation19_spill] sm:$0xff] }
 0x1f7   : > { %v746_v37 = vsel %vm225_vm6, %v743_v48, %v735_v42  ;;  %v939_v3 = vsub.f32 2.0, %v935_v22  ;;  %v874_v62 = vmul.f32 %v718_v12, %v718_v12  ;;  %v858_v57 = vadd.f32 %v2135_v61, %v1961_v6 }
 0x1f8   : > { %v807_v15 = vsel %vm688_vm4, %v2441_v17, %v2440_v53  ;;  %v754_v51 = vadd.f32 %v1994_v41, %v746_v37  ;;  %v2442_v8 = vrot.slane %v1749_v28, 1  ;;  %v2444_v1 = vrot.slane %v2443_v63, 1  ;;  %v2446_v41 = vld [vmem:[#allocation17_spill] sm:$0xff]  ;;  %v2456_v37 = vld [vmem:[#allocation20_spill] sm:$0xff] }
 0x1f9   : > { %v818_v40 = vsel %vm225_vm6, %v815_v9, %v807_v15  ;;  %v2445_v55 = vrot.slane %v1757_v31, 1  ;;  %v2447_v59 = vrot.slane %v2446_v41, 1  ;;  %v903_v18 = vmul.f32 %v899_v39, %v887_v52  ;;  %v618_v52 = vpop.permute.xlu0 %617  ;;  %v2457_v53 = vld [vmem:[#allocation13_spill] sm:$0xff] }
 0x1fa   : > { %v692_v16 = vsel %vm688_vm4, %v2444_v1, %v2442_v8  ;;  %v826_v19 = vadd.f32 %v2448_v14, %v818_v40  ;;  %v943_v13 = vmul.f32 %v1171_v7, %v939_v3  ;;  %v2449_v61 = vrot.slane %v1882_v49, 1 }
 0x1fb   : > { %v772_v11 = vsel %vm688_vm4, %v2447_v59, %v2445_v55  ;;  %v2450_v28 = vrot.slane %v1961_v6, 1  ;;  %v878_v33 = vmul.f32 %v754_v51, %v754_v51  ;;  %v712_v31 = vsel %vm225_vm6, %v708_v30, %v692_v16 }
 0x1fc   : > { %v780_v60 = vperm.slane %v2208_v45, 0  ;;  %v910_v35 = vadd.f32 %v826_v19, %v790_v20  ;;  %v953_v0 = vsub.f32 0.5, %v949_v10  ;;  %v947_v24 = vmul.f32 %v943_v13, %v903_v18  ;;  %v2458_v19 = vld [vmem:[#allocation23_spill] sm:$0xff] }
 0x1fd   : > { %v843_v4 = vsel %vm688_vm4, %v2450_v28, %v2449_v61  ;;  %v882_v49 = vadd.f32 %v878_v33, %v874_v62  ;;  %v2451_v6 = vrot.slane %v1910_v2, 7  ;;  %v2452_v48 = vrot.slane %v1982_v38, 7 }
 0x1fe   : > { %v854_v34 = vsel %vm225_vm6, %v851_v25, %v843_v4  ;;  %v866_v32 = vmul.f32 %v754_v51, %v718_v12  ;;  %v914_v30 = vmul.f32 9.0, %v910_v35  ;;  %v652_v45 = vrot.slane %v2453_v27, 6 }
 0x1ff   : > { %v726_v7 = vsel %vm679_vm3, %v2452_v48, %v2451_v6  ;;  %v2454_v50 = vrot.slane %v1920_v47, 7  ;;  %v2455_v42 = vrot.slane %v1997_v56, 7  ;;  %v951_v39 = vmul.f32 0.5, %v947_v24 }
 0x200   : > { %v862_v22 = vadd.f32 %v858_v57, %v854_v34  ;;  %v666_v9 = vrot.slane %v2456_v37, 6  ;;  %v622_v58 = vsel %vm228_vm1, %v612_v23, %v618_v52  ;;  %v918_v20 = vsub.f32 %v914_v30, %v882_v49 }
 0x201   : > { %v798_v5 = vsel %vm679_vm3, %v2455_v42, %v2454_v50  ;;  %v624_v12 = vsel %vm229_vm2, %v618_v52, %v612_v23  ;;  %v630_v17 = vadd.f32 %v622_v58, %v2457_v53  ;;  %v648_v15 = vmul.f32 %v622_v58, %v622_v58 }
 0x202   : > { %v957_v51 = vmax.f32 %v953_v0, 0.0  ;;  %v955_v25 = vsub.f32 0.5, %v951_v39  ;;  %v906_v10 = vadd.f32 0.0081, %v882_v49  ;;  %v662_v3 = vmul.f32 %v622_v58, %v2148_v29 }
 0x203   : > { %v922_v62 = vadd.f32 0.0729, %v918_v20  ;;  %v632_v40 = vadd.f32 %v630_v17, %v624_v12  ;;  %v656_v57 = vadd.f32 %v652_v45, %v648_v15  ;;  %v658_v8 = vmul.f32 %v624_v12, %v624_v12 }
 0x204   : > { %v870_v63 = vmul.f32 2.0, %v866_v32  ;;  %v890_v1 = vmul.f32 18.0, %v862_v22  ;;  %v670_v16 = vadd.f32 %v666_v9, %v662_v3  ;;  %v672_v55 = vmul.f32 %v624_v12, %v2181_v26 }
 0x205   : > { %v959_v41 = vmax.f32 %v955_v25, 0.0  ;;  %v926_v36 = vmul.f32 %v922_v62, %v906_v10  ;;  %v660_v59 = vadd.f32 %v658_v8, %v656_v57  ;;  %v744_v14 = vperm.slane %v632_v40, 0 }
 0x206   : > { %v720_v18 = vadd.f32 %v2458_v19, %v712_v31  ;;  %v2459_v13 = vrot.slane %v1982_v38, 1  ;;  %v2460_v61 = vrot.slane %v1910_v2, 1  ;;  %v752_v28 = vadd.f32 %v726_v7, %v1910_v2 }
 0x207   : > { %v674_v4 = vadd.f32 %v672_v55, %v670_v16  ;;  %v784_v33 = vsel %vm225_vm6, %v780_v60, %v772_v11  ;;  %1172 = vrcp.f32 %v926_v36  ;;  %v816_v34 = vperm.slane %v660_v59, 0  ;;  %v2463_v60 = vld [vmem:[#allocation24_spill] sm:$0xff] }
 0x208   : > { %v736_v29 = vsel %vm688_vm4, %v2460_v61, %v2459_v13  ;;  %v961_v31 = vmin.f32 %v957_v51, 1.0  ;;  %v2461_v38 = vrot.slane %v1997_v56, 1  ;;  %v2462_v35 = vrot.slane %v1920_v47, 1 }
 0x209   : > { %v748_v26 = vsel %vm225_vm6, %v744_v14, %v736_v29  ;;  %v824_v2 = vadd.f32 %v798_v5, %v1920_v47  ;;  %v963_v0 = vmin.f32 %v959_v41, 1.0  ;;  %v894_v24 = vsub.f32 %v890_v1, %v870_v63 }
 0x20a   : > { %v808_v23 = vsel %vm688_vm4, %v2462_v35, %v2461_v38  ;;  %v756_v52 = vadd.f32 %v752_v28, %v748_v26  ;;  %v792_v49 = vadd.f32 %v2463_v60, %v784_v33  ;;  %v852_v48 = vperm.slane %v674_v4, 0  ;;  %966 = vst.msk [vmem:[%s2304_s8] sm:$0xff] %vm965_vm7, %v961_v31 }
 0x20b   : > { %v820_v11 = vsel %vm225_vm6, %v816_v34, %v808_v23  ;;  %v876_v56 = vmul.f32 %v720_v18, %v720_v18  ;;  %v2464_v32 = vrot.slane %v1930_v21, 7  ;;  %v2465_v30 = vrot.slane %v1999_v54, 7  ;;  %968 = vst.msk [vmem:[%s2304_s8 + $0x10] sm:$0xff] %vm965_vm7, %v963_v0 }
 0x20c   : > { %v828_v6 = vadd.f32 %v824_v2, %v820_v11  ;;  %v880_v7 = vmul.f32 %v756_v52, %v756_v52  ;;  %v898_v50 = vadd.f32 0.0729, %v894_v24  ;;  %v2466_v42 = vrot.slane %v1930_v21, 1 }
 0x20d   : > { %v834_v47 = vsel %vm679_vm3, %v2465_v30, %v2464_v32  ;;  %v1173_v45 = vpop.eup %1172  ;;  %v886_v20 = vadd.f32 0.0081, %v870_v63  ;;  %v868_v54 = vmul.f32 %v756_v52, %v720_v18 }
 0x20e   : > { %v912_v27 = vadd.f32 %v828_v6, %v792_v49  ;;  %v844_v5 = vsel %vm688_vm4, %v2466_v42, %v838_v46  ;;  %v934_v39 = vmul.f32 %v1173_v45, %v926_v36  ;;  %v884_v37 = vadd.f32 %v880_v7, %v876_v56 }
 0x20f   : > { %v856_v22 = vsel %vm225_vm6, %v852_v48, %v844_v5  ;;  %v860_v58 = vadd.f32 %v834_v47, %v1930_v21  ;;  %v902_v15 = vmul.f32 %v898_v50, %v886_v20  ;;  %v872_v3 = vmul.f32 2.0, %v868_v54 }
 0x210   : > { %v916_v9 = vmul.f32 9.0, %v912_v27  ;;  %v938_v12 = vsub.f32 2.0, %v934_v39  ;;  %v908_v44 = vadd.f32 0.0081, %v884_v37 }
 0x211   : > { %v864_v17 = vadd.f32 %v860_v58, %v856_v22  ;;  %v888_v55 = vadd.f32 0.0081, %v872_v3 }
 0x212   : > { %v920_v53 = vsub.f32 %v916_v9, %v884_v37  ;;  %v942_v51 = vmul.f32 %v1173_v45, %v938_v12 }
 0x213   : > { %v892_v43 = vmul.f32 18.0, %v864_v17 }
 0x214   : > { %v924_v46 = vadd.f32 0.0729, %v920_v53  ;;  %v946_v25 = vmul.f32 %v942_v51, %v902_v15 }
 0x215   : > { %v896_v57 = vsub.f32 %v892_v43, %v872_v3 }
 0x216   : > { %v928_v10 = vmul.f32 %v924_v46, %v908_v44  ;;  %v950_v62 = vmul.f32 0.5, %v946_v25 }
 0x217   : > { %v900_v1 = vadd.f32 0.0729, %v896_v57 }
 0x218   : > { %1174 = vrcp.f32 %v928_v10  ;;  %v954_v40 = vsub.f32 0.5, %v950_v62 }
 0x219   : > { %v904_v36 = vmul.f32 %v900_v1, %v888_v55 }
 0x21a   : > { %v958_v21 = vmax.f32 %v954_v40, 0.0 }
 0x21c   : > { %v962_v63 = vmin.f32 %v958_v21, 1.0 }
 0x21e   : > { %v1175_v8 = vpop.eup %1174  ;;  %967 = vst.msk [vmem:[%s2304_s8 + $0x8] sm:$0xff] %vm965_vm7, %v962_v63 }
 0x21f   : > { %v936_v16 = vmul.f32 %v1175_v8, %v928_v10 }
 0x221   : > { %v940_v41 = vsub.f32 2.0, %v936_v16 }
 0x223   : > { %v944_v59 = vmul.f32 %v1175_v8, %v940_v41 }
 0x225   : > { %v948_v14 = vmul.f32 %v944_v59, %v904_v36 }
 0x227   : > { %v952_v19 = vmul.f32 0.5, %v948_v14 }
 0x229   : > { %v956_v18 = vsub.f32 0.5, %v952_v19 }
 0x22b   : > { %v960_v13 = vmax.f32 %v956_v18, 0.0 }
 0x22d   : > { %v964_v61 = vmin.f32 %v960_v13, 1.0 }
 0x22f   : > { %969 = vst.msk [vmem:[%s2304_s8 + $0x18] sm:$0xff] %vm965_vm7, %v964_v61 }
 0x230   : > { %1263 = shalt.err (!%p1260_p13)
}
 0x231   : > { %s1313_s23 = smov 128   ;;  %s1314_s26 = smov 8  }
 0x232   : > { %1114 = dma.vmem_to_hbm [thread:$0]  (%p1379_p10), %s985_s3, 512, %s987_s5, %s971_s30, %s1313_s23, %s1313_s23, %s1314_s26  }
 0x233 PF: > { %p1128_p0 = scmp.ge.s32.totalorder %s1306_s12, 2  ;;  %s1001_s27 = sand.u32 1, %s1294_s9  }
 0x234   : > { %s1002_s20 = scalar_lea.sflag [#allocation4], %s1001_s27 }
 0x235   : > { %p1124_p4 = pnand %p1128_p0, %p1383_p11 }
 0x237   : > { %p1125_p5 = pneg %p1124_p4 }
 0x239   : > { %1289 = dma.done.wait (%p1125_p5), %s1002_s20, 512  }
 0x23a   : > { %1291 = vsyncadd (%p1125_p5), %s1002_s20, 4294966784  ;;  %p18_p7 = scmp.ge.s32.totalorder %s1355_s15, 6   ;;  %s2467_s9 = smov %s1298_s10 }
 0x23b   : > { %s2468_s10 = smov %s1302_s11  ;;  %s2469_s11 = smov %s1367_s18 }
 0x23c   : > { %s2470_s12 = smov %s1355_s15  ;;  %20 = sbr.rel (!%p18_p7) target bundleno = 7 (0x7), region = 86 }
 0x241   :  { %1008 = vsyncpa [#allocation3], 1 }
 0x242   :  { %1010 = vsyncpa [#allocation3 + $0x1], 1 }
 0x243   :  { %1011 = vsyncpa [#allocation6], 1 }
 0x244   :  { %1013 = vsyncpa [#allocation6 + $0x1], 1 }
 0x245   :  { %1014 = vsyncpa [#allocation4], 1 }
 0x246   :  { %1016 = vsyncpa [#allocation4 + $0x1], 1 }

</bundles_post_ra>
